<compile_context>
chip_gen: v7x
topology: tpu7x:2x2x1
jax: 0.10.0
libtpu: 0.0.40
codegen_flags: <defaults>
</compile_context>

<pallas_src>
import jax
import jax.numpy as jnp
from jax import lax
from jax.experimental import pallas as pl
from jax.experimental.pallas import tpu as pltpu


def _round_up(x, m):
    return ((x + m - 1) // m) * m


def _cdiv(a, b):
    return -(-a // b)


def _item_attention_kernel(key_ref, query_ref, m_ref, out_ref,
                           a_scr, mx_scr, d_scr):
    """One (TNG, GD) folded tile of items.

    key_ref   : (TNG, GD)      folded key tile
    query_ref : (R, TNG, GD)   folded query tile
    m_ref     : (GD, GD)       constant: M[g*D+d, g'*D+d'] = W[d] * (g == g')
    out_ref   : (TNG, GD)      f32 output tile (doubles as the accumulator)
    a_scr     : (R, TNG, GD)   lane-dense, D-broadcast logits
    mx_scr    : (TNG, GD)      running max over regions (softmax stabilizer)
    d_scr     : (TNG, GD)      unnormalized softmax denominator
    """
    R = query_ref.shape[0]
    mw = m_ref[...]

    # Pass 1: logits, already broadcast over each item's D lanes — one MXU
    # matmul per region against the combined 128x128 weight.
    def _logits(r, c):
        kq = key_ref[...] * query_ref[r]                       # (TNG, GD)  VPU
        a_scr[r] = jnp.dot(jnp.maximum(kq, 0.0), mw,
                           preferred_element_type=jnp.float32)
        return c

    lax.fori_loop(0, R, _logits, 0, unroll=True)

    # Running max over the region axis; R is the leading axis, so this is pure
    # VPU at full lane occupancy (no cross-lane work).
    mx_scr[...] = a_scr[0]

    def _rmax(r, c):
        mx_scr[...] = jnp.maximum(mx_scr[...], a_scr[r])
        return c

    lax.fori_loop(1, R, _rmax, 0, unroll=True)

    # Pass 2 (fused): unnormalized softmax numerators + weighted query sum.
    # key and the denominator are factored out of the region loop.
    e0 = jnp.exp(a_scr[0] - mx_scr[...])
    d_scr[...] = e0
    out_ref[...] = query_ref[0] * e0

    def _acc(r, c):
        e = jnp.exp(a_scr[r] - mx_scr[...])
        d_scr[...] += e
        out_ref[...] += query_ref[r] * e
        return c

    lax.fori_loop(1, R, _acc, 0, unroll=True)

    # Normalize and apply key:  p = key * (sum_r q_r * e_r) / (sum_r e_r)
    denom = d_scr[...]
    inv = pl.reciprocal(denom, approx=True)                    # EUP
    inv = inv * (2.0 - denom * inv)                            # one Newton step
    out_ref[...] = out_ref[...] * inv * key_ref[...]


def item_attention(key, query, w, b=None):
    """key: (N, D), query: (R, N, D), w: (1, D), b: (1,) -> (N, D).

    `b` is accepted for API parity but unused: it is constant over the region
    axis and cancels exactly in the softmax (numerically identical result).
    """
    N, D = key.shape
    R, Nq, Dq = query.shape
    assert (Nq, Dq) == (N, D)

    key = key.astype(jnp.float32)
    query = query.astype(jnp.float32)

    # Lane-dense fold of G consecutive items into the 128-lane axis, only when
    # the fold is a free row-major reshape (no padded HBM copy of query).
    if D < 128 and 128 % D == 0 and N % (128 // D) == 0:
        G = 128 // D
    else:
        G = 1          # zero-copy fallback; grid boundary blocks handle tails
    GD = G * D
    n_groups = N // G

    key_f = key.reshape(n_groups, GD)
    query_f = query.reshape(R, n_groups, GD)

    # Combined constant: M[g*D+d, g'*D+d'] = W[d] * (g == g').  Folds the Linear
    # weight and the alpha -> D broadcast into a single matmul.
    w_vec = w.reshape(-1).astype(jnp.float32)                       # (D,)
    eye = jnp.eye(G, dtype=jnp.float32)
    m = (eye[:, None, :, None]
         * w_vec[None, :, None, None]
         * jnp.ones((1, 1, 1, D), jnp.float32)).reshape(GD, GD)

    # --- Tile sizing from the actual VMEM capacity (scratch included). ---
    try:
        vmem_cap = int(pltpu.get_tpu_info().vmem_capacity_bytes)
    except Exception:
        vmem_cap = 64 * 1024 * 1024                 # conservative (v7x-sized)
    usable = vmem_cap * 5 // 8                      # blocks (x2 buffered) + scratch
    vmem_limit = vmem_cap * 7 // 8

    gd_pad = _round_up(GD, 128)                     # VMEM lane padding
    # 2*(key+out) blocks + 2*R query blocks + R a_scr + mx + d, all f32.
    bytes_per_row = 4 * gd_pad * (3 * R + 6)
    fixed = 2 * GD * gd_pad * 4                     # resident M blocks
    tng_budget = max(8, ((usable - fixed) // bytes_per_row) // 8 * 8)

    num_tiles = _cdiv(n_groups, tng_budget)
    if n_groups >= 16:
        num_tiles = max(num_tiles, 2)               # v7x: keep both TCs fed
    tng = min(tng_budget, _round_up(_cdiv(n_groups, num_tiles), 8))
    if tng >= n_groups:
        tng = n_groups                              # single full block (always legal)
    grid = (_cdiv(n_groups, tng),)

    cost = pl.CostEstimate(
        flops=int(R * n_groups * GD * (2 * GD + 6) + 6 * n_groups * GD),
        transcendentals=int((R + 1) * n_groups * GD),
        bytes_accessed=int((R + 2) * n_groups * GD * 4),
    )

    out_f = pl.pallas_call(
        _item_attention_kernel,
        out_shape=jax.ShapeDtypeStruct((n_groups, GD), jnp.float32),
        grid=grid,
        in_specs=[
            pl.BlockSpec((tng, GD), lambda i: (i, 0)),           # key tile
            pl.BlockSpec((R, tng, GD), lambda i: (0, i, 0)),     # query tile
            pl.BlockSpec((GD, GD), lambda i: (0, 0)),            # M (resident)
        ],
        out_specs=pl.BlockSpec((tng, GD), lambda i: (i, 0)),
        scratch_shapes=[
            pltpu.VMEM((R, tng, GD), jnp.float32),   # broadcast logits
            pltpu.VMEM((tng, GD), jnp.float32),      # running max
            pltpu.VMEM((tng, GD), jnp.float32),      # softmax denominator
        ],
        compiler_params=pltpu.CompilerParams(
            dimension_semantics=("parallel",),
            vmem_limit_bytes=int(vmem_limit),
        ),
        cost_estimate=cost,
    )(key_f, query_f, m)

    # Unfold (free row-major reshape).
    return out_f.reshape(N, D)


def item_attention_ref(key, query, w, b):
    """Pure-JAX reference mirroring the PyTorch forward exactly."""
    s = jnp.einsum('jk,ijk->ijk', key, query)                           # (R, N, D)
    a = jnp.einsum('nrd,d->nr', jax.nn.relu(s).transpose(1, 0, 2), w[0]) + b[0]
    alpha = jax.nn.softmax(a, axis=1)                                   # (N, R)
    p = jnp.einsum('ijk,ji->jk', s, alpha)                              # (N, D)
    return p


if __name__ == "__main__":
    embed_dim = 32    # D
    region_num = 8    # R

    root = jax.random.PRNGKey(0)
    # 24: lane-dense fold fast path (G=4, zero copies).
    # 21: ragged fallback (G=1, zero copies, exercises Pallas boundary blocks).
    for n_items in (24, 21):
        root, k_key, k_query, k_w, k_b = jax.random.split(root, 5)

        key = jax.random.normal(k_key, (n_items, embed_dim), dtype=jnp.float32)
        query = jax.random.normal(k_query, (region_num, n_items, embed_dim),
                                  dtype=jnp.float32)

        # nn.Linear(embed_dim, 1): weight (1, D), bias (1,), U(-1/sqrt(D), 1/sqrt(D))
        bound = 1.0 / (embed_dim ** 0.5)
        w = jax.random.uniform(k_w, (1, embed_dim), jnp.float32, -bound, bound)
        b = jax.random.uniform(k_b, (1,), jnp.float32, -bound, bound)

        out = jax.block_until_ready(item_attention(key, query, w, b))
        ref = item_attention_ref(key, query, w, b)

        assert out.shape == (n_items, embed_dim)
        # Tolerance covers MXU default precision (f32 operands take bf16 passes)
        # in the in-kernel logits matmul plus the approx-reciprocal softmax.
        err = jnp.max(jnp.abs(out - ref))
        assert jnp.allclose(out, ref, atol=1e-2, rtol=1e-2), (
            f"N={n_items}: mismatch vs reference, max abs err = {err}")

    print("KERNEL_OK")
</pallas_src>

<mosaic_0001>
module attributes {stable_mosaic.version = 11 : i64} {
  func.func @_item_attention_kernel(%arg0: i32, %arg1: memref<6x128xf32, #tpu.memory_space<vmem>>, %arg2: memref<8x6x128xf32, #tpu.memory_space<vmem>>, %arg3: memref<128x128xf32, #tpu.memory_space<vmem>>, %arg4: memref<6x128xf32, #tpu.memory_space<vmem>>, %arg5: memref<8x6x128xf32, #tpu.memory_space<vmem>>, %arg6: memref<6x128xf32, #tpu.memory_space<vmem>>, %arg7: memref<6x128xf32, #tpu.memory_space<vmem>>) attributes {dimension_semantics = [#tpu.dimension_semantics<parallel>], iteration_bounds = array<i64: 1>, scalar_prefetch = 0 : i64, scratch_operands = 3 : i64, tpu.core_type = #tpu.core_type<tc>, window_params = [{transform_indices = @transform_0, window_bounds = array<i64: 6, 128>}, {transform_indices = @transform_1, window_bounds = array<i64: 8, 6, 128>}, {pipeline_mode = #tpu.pipeline_mode<synchronous>, transform_indices = @transform_2, window_bounds = array<i64: 128, 128>}, {transform_indices = @transform_3, window_bounds = array<i64: 6, 128>}]} {
    %c0 = arith.constant 0 : index
    %c0_0 = arith.constant 0 : index
    %0 = vector.load %arg3[%c0, %c0_0] : memref<128x128xf32, #tpu.memory_space<vmem>>, vector<128x128xf32>
    %c0_i32 = arith.constant 0 : i32
    %c0_1 = arith.constant 0 : index
    %c0_2 = arith.constant 0 : index
    %1 = vector.load %arg1[%c0_1, %c0_2] : memref<6x128xf32, #tpu.memory_space<vmem>>, vector<6x128xf32>
    %2 = arith.index_cast %c0_i32 : i32 to index
    %c0_3 = arith.constant 0 : index
    %c0_4 = arith.constant 0 : index
    %3 = vector.load %arg2[%2, %c0_3, %c0_4] : memref<8x6x128xf32, #tpu.memory_space<vmem>>, vector<1x6x128xf32>
    %4 = vector.shape_cast %3 : vector<1x6x128xf32> to vector<6x128xf32>
    %5 = arith.mulf %1, %4 : vector<6x128xf32>
    %cst = arith.constant 0.000000e+00 : f32
    %6 = vector.broadcast %cst : f32 to vector<6x128xf32>
    %7 = arith.maximumf %5, %6 : vector<6x128xf32>
    %cst_5 = arith.constant dense<0.000000e+00> : vector<6x128xf32>
    %8 = tpu.matmul %7, %0, %cst_5 {dimension_numbers = #tpu.dot_dimension_numbers<[1], [0], [0], [1], [0, 0, 1, 1], [], []>} : vector<6x128xf32>, vector<128x128xf32>, vector<6x128xf32> -> vector<6x128xf32>
    %9 = arith.index_cast %c0_i32 : i32 to index
    %c0_6 = arith.constant 0 : index
    %c0_7 = arith.constant 0 : index
    %10 = vector.load %arg5[%9, %c0_6, %c0_7] : memref<8x6x128xf32, #tpu.memory_space<vmem>>, vector<1x6x128xf32>
    %11 = vector.shape_cast %10 : vector<1x6x128xf32> to vector<6x128xf32>
    %12 = vector.shape_cast %8 : vector<6x128xf32> to vector<1x6x128xf32>
    tpu.vector_store %arg5[%9, %c0_6, %c0_7], %12 {strides = array<i32>} : memref<8x6x128xf32, #tpu.memory_space<vmem>>, vector<1x6x128xf32>,
    %c1_i32 = arith.constant 1 : i32
    %c0_8 = arith.constant 0 : index
    %c0_9 = arith.constant 0 : index
    %13 = vector.load %arg1[%c0_8, %c0_9] : memref<6x128xf32, #tpu.memory_space<vmem>>, vector<6x128xf32>
    %14 = arith.index_cast %c1_i32 : i32 to index
    %c0_10 = arith.constant 0 : index
    %c0_11 = arith.constant 0 : index
    %15 = vector.load %arg2[%14, %c0_10, %c0_11] : memref<8x6x128xf32, #tpu.memory_space<vmem>>, vector<1x6x128xf32>
    %16 = vector.shape_cast %15 : vector<1x6x128xf32> to vector<6x128xf32>
    %17 = arith.mulf %13, %16 : vector<6x128xf32>
    %cst_12 = arith.constant 0.000000e+00 : f32
    %18 = vector.broadcast %cst_12 : f32 to vector<6x128xf32>
    %19 = arith.maximumf %17, %18 : vector<6x128xf32>
    %cst_13 = arith.constant dense<0.000000e+00> : vector<6x128xf32>
    %20 = tpu.matmul %19, %0, %cst_13 {dimension_numbers = #tpu.dot_dimension_numbers<[1], [0], [0], [1], [0, 0, 1, 1], [], []>} : vector<6x128xf32>, vector<128x128xf32>, vector<6x128xf32> -> vector<6x128xf32>
    %21 = arith.index_cast %c1_i32 : i32 to index
    %c0_14 = arith.constant 0 : index
    %c0_15 = arith.constant 0 : index
    %22 = vector.load %arg5[%21, %c0_14, %c0_15] : memref<8x6x128xf32, #tpu.memory_space<vmem>>, vector<1x6x128xf32>
    %23 = vector.shape_cast %22 : vector<1x6x128xf32> to vector<6x128xf32>
    %24 = vector.shape_cast %20 : vector<6x128xf32> to vector<1x6x128xf32>
    tpu.vector_store %arg5[%21, %c0_14, %c0_15], %24 {strides = array<i32>} : memref<8x6x128xf32, #tpu.memory_space<vmem>>, vector<1x6x128xf32>,
    %c2_i32 = arith.constant 2 : i32
    %c0_16 = arith.constant 0 : index
    %c0_17 = arith.constant 0 : index
    %25 = vector.load %arg1[%c0_16, %c0_17] : memref<6x128xf32, #tpu.memory_space<vmem>>, vector<6x128xf32>
    %26 = arith.index_cast %c2_i32 : i32 to index
    %c0_18 = arith.constant 0 : index
    %c0_19 = arith.constant 0 : index
    %27 = vector.load %arg2[%26, %c0_18, %c0_19] : memref<8x6x128xf32, #tpu.memory_space<vmem>>, vector<1x6x128xf32>
    %28 = vector.shape_cast %27 : vector<1x6x128xf32> to vector<6x128xf32>
    %29 = arith.mulf %25, %28 : vector<6x128xf32>
    %cst_20 = arith.constant 0.000000e+00 : f32
    %30 = vector.broadcast %cst_20 : f32 to vector<6x128xf32>
    %31 = arith.maximumf %29, %30 : vector<6x128xf32>
    %cst_21 = arith.constant dense<0.000000e+00> : vector<6x128xf32>
    %32 = tpu.matmul %31, %0, %cst_21 {dimension_numbers = #tpu.dot_dimension_numbers<[1], [0], [0], [1], [0, 0, 1, 1], [], []>} : vector<6x128xf32>, vector<128x128xf32>, vector<6x128xf32> -> vector<6x128xf32>
    %33 = arith.index_cast %c2_i32 : i32 to index
    %c0_22 = arith.constant 0 : index
    %c0_23 = arith.constant 0 : index
    %34 = vector.load %arg5[%33, %c0_22, %c0_23] : memref<8x6x128xf32, #tpu.memory_space<vmem>>, vector<1x6x128xf32>
    %35 = vector.shape_cast %34 : vector<1x6x128xf32> to vector<6x128xf32>
    %36 = vector.shape_cast %32 : vector<6x128xf32> to vector<1x6x128xf32>
    tpu.vector_store %arg5[%33, %c0_22, %c0_23], %36 {strides = array<i32>} : memref<8x6x128xf32, #tpu.memory_space<vmem>>, vector<1x6x128xf32>,
    %c3_i32 = arith.constant 3 : i32
    %c0_24 = arith.constant 0 : index
    %c0_25 = arith.constant 0 : index
    %37 = vector.load %arg1[%c0_24, %c0_25] : memref<6x128xf32, #tpu.memory_space<vmem>>, vector<6x128xf32>
    %38 = arith.index_cast %c3_i32 : i32 to index
    %c0_26 = arith.constant 0 : index
    %c0_27 = arith.constant 0 : index
    %39 = vector.load %arg2[%38, %c0_26, %c0_27] : memref<8x6x128xf32, #tpu.memory_space<vmem>>, vector<1x6x128xf32>
    %40 = vector.shape_cast %39 : vector<1x6x128xf32> to vector<6x128xf32>
    %41 = arith.mulf %37, %40 : vector<6x128xf32>
    %cst_28 = arith.constant 0.000000e+00 : f32
    %42 = vector.broadcast %cst_28 : f32 to vector<6x128xf32>
    %43 = arith.maximumf %41, %42 : vector<6x128xf32>
    %cst_29 = arith.constant dense<0.000000e+00> : vector<6x128xf32>
    %44 = tpu.matmul %43, %0, %cst_29 {dimension_numbers = #tpu.dot_dimension_numbers<[1], [0], [0], [1], [0, 0, 1, 1], [], []>} : vector<6x128xf32>, vector<128x128xf32>, vector<6x128xf32> -> vector<6x128xf32>
    %45 = arith.index_cast %c3_i32 : i32 to index
    %c0_30 = arith.constant 0 : index
    %c0_31 = arith.constant 0 : index
    %46 = vector.load %arg5[%45, %c0_30, %c0_31] : memref<8x6x128xf32, #tpu.memory_space<vmem>>, vector<1x6x128xf32>
    %47 = vector.shape_cast %46 : vector<1x6x128xf32> to vector<6x128xf32>
    %48 = vector.shape_cast %44 : vector<6x128xf32> to vector<1x6x128xf32>
    tpu.vector_store %arg5[%45, %c0_30, %c0_31], %48 {strides = array<i32>} : memref<8x6x128xf32, #tpu.memory_space<vmem>>, vector<1x6x128xf32>,
    %c4_i32 = arith.constant 4 : i32
    %c0_32 = arith.constant 0 : index
    %c0_33 = arith.constant 0 : index
    %49 = vector.load %arg1[%c0_32, %c0_33] : memref<6x128xf32, #tpu.memory_space<vmem>>, vector<6x128xf32>
    %50 = arith.index_cast %c4_i32 : i32 to index
    %c0_34 = arith.constant 0 : index
    %c0_35 = arith.constant 0 : index
    %51 = vector.load %arg2[%50, %c0_34, %c0_35] : memref<8x6x128xf32, #tpu.memory_space<vmem>>, vector<1x6x128xf32>
    %52 = vector.shape_cast %51 : vector<1x6x128xf32> to vector<6x128xf32>
    %53 = arith.mulf %49, %52 : vector<6x128xf32>
    %cst_36 = arith.constant 0.000000e+00 : f32
    %54 = vector.broadcast %cst_36 : f32 to vector<6x128xf32>
    %55 = arith.maximumf %53, %54 : vector<6x128xf32>
    %cst_37 = arith.constant dense<0.000000e+00> : vector<6x128xf32>
    %56 = tpu.matmul %55, %0, %cst_37 {dimension_numbers = #tpu.dot_dimension_numbers<[1], [0], [0], [1], [0, 0, 1, 1], [], []>} : vector<6x128xf32>, vector<128x128xf32>, vector<6x128xf32> -> vector<6x128xf32>
    %57 = arith.index_cast %c4_i32 : i32 to index
    %c0_38 = arith.constant 0 : index
    %c0_39 = arith.constant 0 : index
    %58 = vector.load %arg5[%57, %c0_38, %c0_39] : memref<8x6x128xf32, #tpu.memory_space<vmem>>, vector<1x6x128xf32>
    %59 = vector.shape_cast %58 : vector<1x6x128xf32> to vector<6x128xf32>
    %60 = vector.shape_cast %56 : vector<6x128xf32> to vector<1x6x128xf32>
    tpu.vector_store %arg5[%57, %c0_38, %c0_39], %60 {strides = array<i32>} : memref<8x6x128xf32, #tpu.memory_space<vmem>>, vector<1x6x128xf32>,
    %c5_i32 = arith.constant 5 : i32
    %c0_40 = arith.constant 0 : index
    %c0_41 = arith.constant 0 : index
    %61 = vector.load %arg1[%c0_40, %c0_41] : memref<6x128xf32, #tpu.memory_space<vmem>>, vector<6x128xf32>
    %62 = arith.index_cast %c5_i32 : i32 to index
    %c0_42 = arith.constant 0 : index
    %c0_43 = arith.constant 0 : index
    %63 = vector.load %arg2[%62, %c0_42, %c0_43] : memref<8x6x128xf32, #tpu.memory_space<vmem>>, vector<1x6x128xf32>
    %64 = vector.shape_cast %63 : vector<1x6x128xf32> to vector<6x128xf32>
    %65 = arith.mulf %61, %64 : vector<6x128xf32>
    %cst_44 = arith.constant 0.000000e+00 : f32
    %66 = vector.broadcast %cst_44 : f32 to vector<6x128xf32>
    %67 = arith.maximumf %65, %66 : vector<6x128xf32>
    %cst_45 = arith.constant dense<0.000000e+00> : vector<6x128xf32>
    %68 = tpu.matmul %67, %0, %cst_45 {dimension_numbers = #tpu.dot_dimension_numbers<[1], [0], [0], [1], [0, 0, 1, 1], [], []>} : vector<6x128xf32>, vector<128x128xf32>, vector<6x128xf32> -> vector<6x128xf32>
    %69 = arith.index_cast %c5_i32 : i32 to index
    %c0_46 = arith.constant 0 : index
    %c0_47 = arith.constant 0 : index
    %70 = vector.load %arg5[%69, %c0_46, %c0_47] : memref<8x6x128xf32, #tpu.memory_space<vmem>>, vector<1x6x128xf32>
    %71 = vector.shape_cast %70 : vector<1x6x128xf32> to vector<6x128xf32>
    %72 = vector.shape_cast %68 : vector<6x128xf32> to vector<1x6x128xf32>
    tpu.vector_store %arg5[%69, %c0_46, %c0_47], %72 {strides = array<i32>} : memref<8x6x128xf32, #tpu.memory_space<vmem>>, vector<1x6x128xf32>,
    %c6_i32 = arith.constant 6 : i32
    %c0_48 = arith.constant 0 : index
    %c0_49 = arith.constant 0 : index
    %73 = vector.load %arg1[%c0_48, %c0_49] : memref<6x128xf32, #tpu.memory_space<vmem>>, vector<6x128xf32>
    %74 = arith.index_cast %c6_i32 : i32 to index
    %c0_50 = arith.constant 0 : index
    %c0_51 = arith.constant 0 : index
    %75 = vector.load %arg2[%74, %c0_50, %c0_51] : memref<8x6x128xf32, #tpu.memory_space<vmem>>, vector<1x6x128xf32>
    %76 = vector.shape_cast %75 : vector<1x6x128xf32> to vector<6x128xf32>
    %77 = arith.mulf %73, %76 : vector<6x128xf32>
    %cst_52 = arith.constant 0.000000e+00 : f32
    %78 = vector.broadcast %cst_52 : f32 to vector<6x128xf32>
    %79 = arith.maximumf %77, %78 : vector<6x128xf32>
    %cst_53 = arith.constant dense<0.000000e+00> : vector<6x128xf32>
    %80 = tpu.matmul %79, %0, %cst_53 {dimension_numbers = #tpu.dot_dimension_numbers<[1], [0], [0], [1], [0, 0, 1, 1], [], []>} : vector<6x128xf32>, vector<128x128xf32>, vector<6x128xf32> -> vector<6x128xf32>
    %81 = arith.index_cast %c6_i32 : i32 to index
    %c0_54 = arith.constant 0 : index
    %c0_55 = arith.constant 0 : index
    %82 = vector.load %arg5[%81, %c0_54, %c0_55] : memref<8x6x128xf32, #tpu.memory_space<vmem>>, vector<1x6x128xf32>
    %83 = vector.shape_cast %82 : vector<1x6x128xf32> to vector<6x128xf32>
    %84 = vector.shape_cast %80 : vector<6x128xf32> to vector<1x6x128xf32>
    tpu.vector_store %arg5[%81, %c0_54, %c0_55], %84 {strides = array<i32>} : memref<8x6x128xf32, #tpu.memory_space<vmem>>, vector<1x6x128xf32>,
    %c7_i32 = arith.constant 7 : i32
    %c0_56 = arith.constant 0 : index
    %c0_57 = arith.constant 0 : index
    %85 = vector.load %arg1[%c0_56, %c0_57] : memref<6x128xf32, #tpu.memory_space<vmem>>, vector<6x128xf32>
    %86 = arith.index_cast %c7_i32 : i32 to index
    %c0_58 = arith.constant 0 : index
    %c0_59 = arith.constant 0 : index
    %87 = vector.load %arg2[%86, %c0_58, %c0_59] : memref<8x6x128xf32, #tpu.memory_space<vmem>>, vector<1x6x128xf32>
    %88 = vector.shape_cast %87 : vector<1x6x128xf32> to vector<6x128xf32>
    %89 = arith.mulf %85, %88 : vector<6x128xf32>
    %cst_60 = arith.constant 0.000000e+00 : f32
    %90 = vector.broadcast %cst_60 : f32 to vector<6x128xf32>
    %91 = arith.maximumf %89, %90 : vector<6x128xf32>
    %cst_61 = arith.constant dense<0.000000e+00> : vector<6x128xf32>
    %92 = tpu.matmul %91, %0, %cst_61 {dimension_numbers = #tpu.dot_dimension_numbers<[1], [0], [0], [1], [0, 0, 1, 1], [], []>} : vector<6x128xf32>, vector<128x128xf32>, vector<6x128xf32> -> vector<6x128xf32>
    %93 = arith.index_cast %c7_i32 : i32 to index
    %c0_62 = arith.constant 0 : index
    %c0_63 = arith.constant 0 : index
    %94 = vector.load %arg5[%93, %c0_62, %c0_63] : memref<8x6x128xf32, #tpu.memory_space<vmem>>, vector<1x6x128xf32>
    %95 = vector.shape_cast %94 : vector<1x6x128xf32> to vector<6x128xf32>
    %96 = vector.shape_cast %92 : vector<6x128xf32> to vector<1x6x128xf32>
    tpu.vector_store %arg5[%93, %c0_62, %c0_63], %96 {strides = array<i32>} : memref<8x6x128xf32, #tpu.memory_space<vmem>>, vector<1x6x128xf32>,
    %c8_i32 = arith.constant 8 : i32
    %c0_64 = arith.constant 0 : index
    %c0_65 = arith.constant 0 : index
    %c0_66 = arith.constant 0 : index
    %97 = vector.load %arg5[%c0_64, %c0_65, %c0_66] : memref<8x6x128xf32, #tpu.memory_space<vmem>>, vector<1x6x128xf32>
    %98 = vector.shape_cast %97 : vector<1x6x128xf32> to vector<6x128xf32>
    %c0_67 = arith.constant 0 : index
    %c0_68 = arith.constant 0 : index
    %99 = vector.load %arg6[%c0_67, %c0_68] : memref<6x128xf32, #tpu.memory_space<vmem>>, vector<6x128xf32>
    tpu.vector_store %arg6[%c0_67, %c0_68], %98 {strides = array<i32>} : memref<6x128xf32, #tpu.memory_space<vmem>>, vector<6x128xf32>,
    %c1_i32_69 = arith.constant 1 : i32
    %c0_70 = arith.constant 0 : index
    %c0_71 = arith.constant 0 : index
    %100 = vector.load %arg6[%c0_70, %c0_71] : memref<6x128xf32, #tpu.memory_space<vmem>>, vector<6x128xf32>
    %101 = arith.index_cast %c1_i32_69 : i32 to index
    %c0_72 = arith.constant 0 : index
    %c0_73 = arith.constant 0 : index
    %102 = vector.load %arg5[%101, %c0_72, %c0_73] : memref<8x6x128xf32, #tpu.memory_space<vmem>>, vector<1x6x128xf32>
    %103 = vector.shape_cast %102 : vector<1x6x128xf32> to vector<6x128xf32>
    %104 = arith.maximumf %100, %103 : vector<6x128xf32>
    %c0_74 = arith.constant 0 : index
    %c0_75 = arith.constant 0 : index
    %105 = vector.load %arg6[%c0_74, %c0_75] : memref<6x128xf32, #tpu.memory_space<vmem>>, vector<6x128xf32>
    tpu.vector_store %arg6[%c0_74, %c0_75], %104 {strides = array<i32>} : memref<6x128xf32, #tpu.memory_space<vmem>>, vector<6x128xf32>,
    %c2_i32_76 = arith.constant 2 : i32
    %c0_77 = arith.constant 0 : index
    %c0_78 = arith.constant 0 : index
    %106 = vector.load %arg6[%c0_77, %c0_78] : memref<6x128xf32, #tpu.memory_space<vmem>>, vector<6x128xf32>
    %107 = arith.index_cast %c2_i32_76 : i32 to index
    %c0_79 = arith.constant 0 : index
    %c0_80 = arith.constant 0 : index
    %108 = vector.load %arg5[%107, %c0_79, %c0_80] : memref<8x6x128xf32, #tpu.memory_space<vmem>>, vector<1x6x128xf32>
    %109 = vector.shape_cast %108 : vector<1x6x128xf32> to vector<6x128xf32>
    %110 = arith.maximumf %106, %109 : vector<6x128xf32>
    %c0_81 = arith.constant 0 : index
    %c0_82 = arith.constant 0 : index
    %111 = vector.load %arg6[%c0_81, %c0_82] : memref<6x128xf32, #tpu.memory_space<vmem>>, vector<6x128xf32>
    tpu.vector_store %arg6[%c0_81, %c0_82], %110 {strides = array<i32>} : memref<6x128xf32, #tpu.memory_space<vmem>>, vector<6x128xf32>,
    %c3_i32_83 = arith.constant 3 : i32
    %c0_84 = arith.constant 0 : index
    %c0_85 = arith.constant 0 : index
    %112 = vector.load %arg6[%c0_84, %c0_85] : memref<6x128xf32, #tpu.memory_space<vmem>>, vector<6x128xf32>
    %113 = arith.index_cast %c3_i32_83 : i32 to index
    %c0_86 = arith.constant 0 : index
    %c0_87 = arith.constant 0 : index
    %114 = vector.load %arg5[%113, %c0_86, %c0_87] : memref<8x6x128xf32, #tpu.memory_space<vmem>>, vector<1x6x128xf32>
    %115 = vector.shape_cast %114 : vector<1x6x128xf32> to vector<6x128xf32>
    %116 = arith.maximumf %112, %115 : vector<6x128xf32>
    %c0_88 = arith.constant 0 : index
    %c0_89 = arith.constant 0 : index
    %117 = vector.load %arg6[%c0_88, %c0_89] : memref<6x128xf32, #tpu.memory_space<vmem>>, vector<6x128xf32>
    tpu.vector_store %arg6[%c0_88, %c0_89], %116 {strides = array<i32>} : memref<6x128xf32, #tpu.memory_space<vmem>>, vector<6x128xf32>,
    %c4_i32_90 = arith.constant 4 : i32
    %c0_91 = arith.constant 0 : index
    %c0_92 = arith.constant 0 : index
    %118 = vector.load %arg6[%c0_91, %c0_92] : memref<6x128xf32, #tpu.memory_space<vmem>>, vector<6x128xf32>
    %119 = arith.index_cast %c4_i32_90 : i32 to index
    %c0_93 = arith.constant 0 : index
    %c0_94 = arith.constant 0 : index
    %120 = vector.load %arg5[%119, %c0_93, %c0_94] : memref<8x6x128xf32, #tpu.memory_space<vmem>>, vector<1x6x128xf32>
    %121 = vector.shape_cast %120 : vector<1x6x128xf32> to vector<6x128xf32>
    %122 = arith.maximumf %118, %121 : vector<6x128xf32>
    %c0_95 = arith.constant 0 : index
    %c0_96 = arith.constant 0 : index
    %123 = vector.load %arg6[%c0_95, %c0_96] : memref<6x128xf32, #tpu.memory_space<vmem>>, vector<6x128xf32>
    tpu.vector_store %arg6[%c0_95, %c0_96], %122 {strides = array<i32>} : memref<6x128xf32, #tpu.memory_space<vmem>>, vector<6x128xf32>,
    %c5_i32_97 = arith.constant 5 : i32
    %c0_98 = arith.constant 0 : index
    %c0_99 = arith.constant 0 : index
    %124 = vector.load %arg6[%c0_98, %c0_99] : memref<6x128xf32, #tpu.memory_space<vmem>>, vector<6x128xf32>
    %125 = arith.index_cast %c5_i32_97 : i32 to index
    %c0_100 = arith.constant 0 : index
    %c0_101 = arith.constant 0 : index
    %126 = vector.load %arg5[%125, %c0_100, %c0_101] : memref<8x6x128xf32, #tpu.memory_space<vmem>>, vector<1x6x128xf32>
    %127 = vector.shape_cast %126 : vector<1x6x128xf32> to vector<6x128xf32>
    %128 = arith.maximumf %124, %127 : vector<6x128xf32>
    %c0_102 = arith.constant 0 : index
    %c0_103 = arith.constant 0 : index
    %129 = vector.load %arg6[%c0_102, %c0_103] : memref<6x128xf32, #tpu.memory_space<vmem>>, vector<6x128xf32>
    tpu.vector_store %arg6[%c0_102, %c0_103], %128 {strides = array<i32>} : memref<6x128xf32, #tpu.memory_space<vmem>>, vector<6x128xf32>,
    %c6_i32_104 = arith.constant 6 : i32
    %c0_105 = arith.constant 0 : index
    %c0_106 = arith.constant 0 : index
    %130 = vector.load %arg6[%c0_105, %c0_106] : memref<6x128xf32, #tpu.memory_space<vmem>>, vector<6x128xf32>
    %131 = arith.index_cast %c6_i32_104 : i32 to index
    %c0_107 = arith.constant 0 : index
    %c0_108 = arith.constant 0 : index
    %132 = vector.load %arg5[%131, %c0_107, %c0_108] : memref<8x6x128xf32, #tpu.memory_space<vmem>>, vector<1x6x128xf32>
    %133 = vector.shape_cast %132 : vector<1x6x128xf32> to vector<6x128xf32>
    %134 = arith.maximumf %130, %133 : vector<6x128xf32>
    %c0_109 = arith.constant 0 : index
    %c0_110 = arith.constant 0 : index
    %135 = vector.load %arg6[%c0_109, %c0_110] : memref<6x128xf32, #tpu.memory_space<vmem>>, vector<6x128xf32>
    tpu.vector_store %arg6[%c0_109, %c0_110], %134 {strides = array<i32>} : memref<6x128xf32, #tpu.memory_space<vmem>>, vector<6x128xf32>,
    %c7_i32_111 = arith.constant 7 : i32
    %c0_112 = arith.constant 0 : index
    %c0_113 = arith.constant 0 : index
    %136 = vector.load %arg6[%c0_112, %c0_113] : memref<6x128xf32, #tpu.memory_space<vmem>>, vector<6x128xf32>
    %137 = arith.index_cast %c7_i32_111 : i32 to index
    %c0_114 = arith.constant 0 : index
    %c0_115 = arith.constant 0 : index
    %138 = vector.load %arg5[%137, %c0_114, %c0_115] : memref<8x6x128xf32, #tpu.memory_space<vmem>>, vector<1x6x128xf32>
    %139 = vector.shape_cast %138 : vector<1x6x128xf32> to vector<6x128xf32>
    %140 = arith.maximumf %136, %139 : vector<6x128xf32>
    %c0_116 = arith.constant 0 : index
    %c0_117 = arith.constant 0 : index
    %141 = vector.load %arg6[%c0_116, %c0_117] : memref<6x128xf32, #tpu.memory_space<vmem>>, vector<6x128xf32>
    tpu.vector_store %arg6[%c0_116, %c0_117], %140 {strides = array<i32>} : memref<6x128xf32, #tpu.memory_space<vmem>>, vector<6x128xf32>,
    %c7_i32_118 = arith.constant 7 : i32
    %c0_119 = arith.constant 0 : index
    %c0_120 = arith.constant 0 : index
    %c0_121 = arith.constant 0 : index
    %142 = vector.load %arg5[%c0_119, %c0_120, %c0_121] : memref<8x6x128xf32, #tpu.memory_space<vmem>>, vector<1x6x128xf32>
    %143 = vector.shape_cast %142 : vector<1x6x128xf32> to vector<6x128xf32>
    %c0_122 = arith.constant 0 : index
    %c0_123 = arith.constant 0 : index
    %144 = vector.load %arg6[%c0_122, %c0_123] : memref<6x128xf32, #tpu.memory_space<vmem>>, vector<6x128xf32>
    %145 = arith.subf %143, %144 : vector<6x128xf32>
    %146 = math.exp %145 : vector<6x128xf32>
    %c0_124 = arith.constant 0 : index
    %c0_125 = arith.constant 0 : index
    %147 = vector.load %arg7[%c0_124, %c0_125] : memref<6x128xf32, #tpu.memory_space<vmem>>, vector<6x128xf32>
    tpu.vector_store %arg7[%c0_124, %c0_125], %146 {strides = array<i32>} : memref<6x128xf32, #tpu.memory_space<vmem>>, vector<6x128xf32>,
    %c0_126 = arith.constant 0 : index
    %c0_127 = arith.constant 0 : index
    %c0_128 = arith.constant 0 : index
    %148 = vector.load %arg2[%c0_126, %c0_127, %c0_128] : memref<8x6x128xf32, #tpu.memory_space<vmem>>, vector<1x6x128xf32>
    %149 = vector.shape_cast %148 : vector<1x6x128xf32> to vector<6x128xf32>
    %150 = arith.mulf %149, %146 : vector<6x128xf32>
    %c0_129 = arith.constant 0 : index
    %c0_130 = arith.constant 0 : index
    %151 = vector.load %arg4[%c0_129, %c0_130] : memref<6x128xf32, #tpu.memory_space<vmem>>, vector<6x128xf32>
    tpu.vector_store %arg4[%c0_129, %c0_130], %150 {strides = array<i32>} : memref<6x128xf32, #tpu.memory_space<vmem>>, vector<6x128xf32>,
    %c1_i32_131 = arith.constant 1 : i32
    %152 = arith.index_cast %c1_i32_131 : i32 to index
    %c0_132 = arith.constant 0 : index
    %c0_133 = arith.constant 0 : index
    %153 = vector.load %arg5[%152, %c0_132, %c0_133] : memref<8x6x128xf32, #tpu.memory_space<vmem>>, vector<1x6x128xf32>
    %154 = vector.shape_cast %153 : vector<1x6x128xf32> to vector<6x128xf32>
    %c0_134 = arith.constant 0 : index
    %c0_135 = arith.constant 0 : index
    %155 = vector.load %arg6[%c0_134, %c0_135] : memref<6x128xf32, #tpu.memory_space<vmem>>, vector<6x128xf32>
    %156 = arith.subf %154, %155 : vector<6x128xf32>
    %157 = math.exp %156 : vector<6x128xf32>
    %c0_136 = arith.constant 0 : index
    %c0_137 = arith.constant 0 : index
    %158 = vector.load %arg7[%c0_136, %c0_137] : memref<6x128xf32, #tpu.memory_space<vmem>>, vector<6x128xf32>
    %159 = arith.addf %158, %157 : vector<6x128xf32>
    %c0_138 = arith.constant 0 : index
    %c0_139 = arith.constant 0 : index
    %160 = vector.load %arg7[%c0_138, %c0_139] : memref<6x128xf32, #tpu.memory_space<vmem>>, vector<6x128xf32>
    tpu.vector_store %arg7[%c0_138, %c0_139], %159 {strides = array<i32>} : memref<6x128xf32, #tpu.memory_space<vmem>>, vector<6x128xf32>,
    %c0_140 = arith.constant 0 : index
    %c0_141 = arith.constant 0 : index
    %161 = vector.load %arg4[%c0_140, %c0_141] : memref<6x128xf32, #tpu.memory_space<vmem>>, vector<6x128xf32>
    %162 = arith.index_cast %c1_i32_131 : i32 to index
    %c0_142 = arith.constant 0 : index
    %c0_143 = arith.constant 0 : index
    %163 = vector.load %arg2[%162, %c0_142, %c0_143] : memref<8x6x128xf32, #tpu.memory_space<vmem>>, vector<1x6x128xf32>
    %164 = vector.shape_cast %163 : vector<1x6x128xf32> to vector<6x128xf32>
    %165 = arith.mulf %164, %157 : vector<6x128xf32>
    %166 = arith.addf %161, %165 : vector<6x128xf32>
    %c0_144 = arith.constant 0 : index
    %c0_145 = arith.constant 0 : index
    %167 = vector.load %arg4[%c0_144, %c0_145] : memref<6x128xf32, #tpu.memory_space<vmem>>, vector<6x128xf32>
    tpu.vector_store %arg4[%c0_144, %c0_145], %166 {strides = array<i32>} : memref<6x128xf32, #tpu.memory_space<vmem>>, vector<6x128xf32>,
    %c2_i32_146 = arith.constant 2 : i32
    %168 = arith.index_cast %c2_i32_146 : i32 to index
    %c0_147 = arith.constant 0 : index
    %c0_148 = arith.constant 0 : index
    %169 = vector.load %arg5[%168, %c0_147, %c0_148] : memref<8x6x128xf32, #tpu.memory_space<vmem>>, vector<1x6x128xf32>
    %170 = vector.shape_cast %169 : vector<1x6x128xf32> to vector<6x128xf32>
    %c0_149 = arith.constant 0 : index
    %c0_150 = arith.constant 0 : index
    %171 = vector.load %arg6[%c0_149, %c0_150] : memref<6x128xf32, #tpu.memory_space<vmem>>, vector<6x128xf32>
    %172 = arith.subf %170, %171 : vector<6x128xf32>
    %173 = math.exp %172 : vector<6x128xf32>
    %c0_151 = arith.constant 0 : index
    %c0_152 = arith.constant 0 : index
    %174 = vector.load %arg7[%c0_151, %c0_152] : memref<6x128xf32, #tpu.memory_space<vmem>>, vector<6x128xf32>
    %175 = arith.addf %174, %173 : vector<6x128xf32>
    %c0_153 = arith.constant 0 : index
    %c0_154 = arith.constant 0 : index
    %176 = vector.load %arg7[%c0_153, %c0_154] : memref<6x128xf32, #tpu.memory_space<vmem>>, vector<6x128xf32>
    tpu.vector_store %arg7[%c0_153, %c0_154], %175 {strides = array<i32>} : memref<6x128xf32, #tpu.memory_space<vmem>>, vector<6x128xf32>,
    %c0_155 = arith.constant 0 : index
    %c0_156 = arith.constant 0 : index
    %177 = vector.load %arg4[%c0_155, %c0_156] : memref<6x128xf32, #tpu.memory_space<vmem>>, vector<6x128xf32>
    %178 = arith.index_cast %c2_i32_146 : i32 to index
    %c0_157 = arith.constant 0 : index
    %c0_158 = arith.constant 0 : index
    %179 = vector.load %arg2[%178, %c0_157, %c0_158] : memref<8x6x128xf32, #tpu.memory_space<vmem>>, vector<1x6x128xf32>
    %180 = vector.shape_cast %179 : vector<1x6x128xf32> to vector<6x128xf32>
    %181 = arith.mulf %180, %173 : vector<6x128xf32>
    %182 = arith.addf %177, %181 : vector<6x128xf32>
    %c0_159 = arith.constant 0 : index
    %c0_160 = arith.constant 0 : index
    %183 = vector.load %arg4[%c0_159, %c0_160] : memref<6x128xf32, #tpu.memory_space<vmem>>, vector<6x128xf32>
    tpu.vector_store %arg4[%c0_159, %c0_160], %182 {strides = array<i32>} : memref<6x128xf32, #tpu.memory_space<vmem>>, vector<6x128xf32>,
    %c3_i32_161 = arith.constant 3 : i32
    %184 = arith.index_cast %c3_i32_161 : i32 to index
    %c0_162 = arith.constant 0 : index
    %c0_163 = arith.constant 0 : index
    %185 = vector.load %arg5[%184, %c0_162, %c0_163] : memref<8x6x128xf32, #tpu.memory_space<vmem>>, vector<1x6x128xf32>
    %186 = vector.shape_cast %185 : vector<1x6x128xf32> to vector<6x128xf32>
    %c0_164 = arith.constant 0 : index
    %c0_165 = arith.constant 0 : index
    %187 = vector.load %arg6[%c0_164, %c0_165] : memref<6x128xf32, #tpu.memory_space<vmem>>, vector<6x128xf32>
    %188 = arith.subf %186, %187 : vector<6x128xf32>
    %189 = math.exp %188 : vector<6x128xf32>
    %c0_166 = arith.constant 0 : index
    %c0_167 = arith.constant 0 : index
    %190 = vector.load %arg7[%c0_166, %c0_167] : memref<6x128xf32, #tpu.memory_space<vmem>>, vector<6x128xf32>
    %191 = arith.addf %190, %189 : vector<6x128xf32>
    %c0_168 = arith.constant 0 : index
    %c0_169 = arith.constant 0 : index
    %192 = vector.load %arg7[%c0_168, %c0_169] : memref<6x128xf32, #tpu.memory_space<vmem>>, vector<6x128xf32>
    tpu.vector_store %arg7[%c0_168, %c0_169], %191 {strides = array<i32>} : memref<6x128xf32, #tpu.memory_space<vmem>>, vector<6x128xf32>,
    %c0_170 = arith.constant 0 : index
    %c0_171 = arith.constant 0 : index
    %193 = vector.load %arg4[%c0_170, %c0_171] : memref<6x128xf32, #tpu.memory_space<vmem>>, vector<6x128xf32>
    %194 = arith.index_cast %c3_i32_161 : i32 to index
    %c0_172 = arith.constant 0 : index
    %c0_173 = arith.constant 0 : index
    %195 = vector.load %arg2[%194, %c0_172, %c0_173] : memref<8x6x128xf32, #tpu.memory_space<vmem>>, vector<1x6x128xf32>
    %196 = vector.shape_cast %195 : vector<1x6x128xf32> to vector<6x128xf32>
    %197 = arith.mulf %196, %189 : vector<6x128xf32>
    %198 = arith.addf %193, %197 : vector<6x128xf32>
    %c0_174 = arith.constant 0 : index
    %c0_175 = arith.constant 0 : index
    %199 = vector.load %arg4[%c0_174, %c0_175] : memref<6x128xf32, #tpu.memory_space<vmem>>, vector<6x128xf32>
    tpu.vector_store %arg4[%c0_174, %c0_175], %198 {strides = array<i32>} : memref<6x128xf32, #tpu.memory_space<vmem>>, vector<6x128xf32>,
    %c4_i32_176 = arith.constant 4 : i32
    %200 = arith.index_cast %c4_i32_176 : i32 to index
    %c0_177 = arith.constant 0 : index
    %c0_178 = arith.constant 0 : index
    %201 = vector.load %arg5[%200, %c0_177, %c0_178] : memref<8x6x128xf32, #tpu.memory_space<vmem>>, vector<1x6x128xf32>
    %202 = vector.shape_cast %201 : vector<1x6x128xf32> to vector<6x128xf32>
    %c0_179 = arith.constant 0 : index
    %c0_180 = arith.constant 0 : index
    %203 = vector.load %arg6[%c0_179, %c0_180] : memref<6x128xf32, #tpu.memory_space<vmem>>, vector<6x128xf32>
    %204 = arith.subf %202, %203 : vector<6x128xf32>
    %205 = math.exp %204 : vector<6x128xf32>
    %c0_181 = arith.constant 0 : index
    %c0_182 = arith.constant 0 : index
    %206 = vector.load %arg7[%c0_181, %c0_182] : memref<6x128xf32, #tpu.memory_space<vmem>>, vector<6x128xf32>
    %207 = arith.addf %206, %205 : vector<6x128xf32>
    %c0_183 = arith.constant 0 : index
    %c0_184 = arith.constant 0 : index
    %208 = vector.load %arg7[%c0_183, %c0_184] : memref<6x128xf32, #tpu.memory_space<vmem>>, vector<6x128xf32>
    tpu.vector_store %arg7[%c0_183, %c0_184], %207 {strides = array<i32>} : memref<6x128xf32, #tpu.memory_space<vmem>>, vector<6x128xf32>,
    %c0_185 = arith.constant 0 : index
    %c0_186 = arith.constant 0 : index
    %209 = vector.load %arg4[%c0_185, %c0_186] : memref<6x128xf32, #tpu.memory_space<vmem>>, vector<6x128xf32>
    %210 = arith.index_cast %c4_i32_176 : i32 to index
    %c0_187 = arith.constant 0 : index
    %c0_188 = arith.constant 0 : index
    %211 = vector.load %arg2[%210, %c0_187, %c0_188] : memref<8x6x128xf32, #tpu.memory_space<vmem>>, vector<1x6x128xf32>
    %212 = vector.shape_cast %211 : vector<1x6x128xf32> to vector<6x128xf32>
    %213 = arith.mulf %212, %205 : vector<6x128xf32>
    %214 = arith.addf %209, %213 : vector<6x128xf32>
    %c0_189 = arith.constant 0 : index
    %c0_190 = arith.constant 0 : index
    %215 = vector.load %arg4[%c0_189, %c0_190] : memref<6x128xf32, #tpu.memory_space<vmem>>, vector<6x128xf32>
    tpu.vector_store %arg4[%c0_189, %c0_190], %214 {strides = array<i32>} : memref<6x128xf32, #tpu.memory_space<vmem>>, vector<6x128xf32>,
    %c5_i32_191 = arith.constant 5 : i32
    %216 = arith.index_cast %c5_i32_191 : i32 to index
    %c0_192 = arith.constant 0 : index
    %c0_193 = arith.constant 0 : index
    %217 = vector.load %arg5[%216, %c0_192, %c0_193] : memref<8x6x128xf32, #tpu.memory_space<vmem>>, vector<1x6x128xf32>
    %218 = vector.shape_cast %217 : vector<1x6x128xf32> to vector<6x128xf32>
    %c0_194 = arith.constant 0 : index
    %c0_195 = arith.constant 0 : index
    %219 = vector.load %arg6[%c0_194, %c0_195] : memref<6x128xf32, #tpu.memory_space<vmem>>, vector<6x128xf32>
    %220 = arith.subf %218, %219 : vector<6x128xf32>
    %221 = math.exp %220 : vector<6x128xf32>
    %c0_196 = arith.constant 0 : index
    %c0_197 = arith.constant 0 : index
    %222 = vector.load %arg7[%c0_196, %c0_197] : memref<6x128xf32, #tpu.memory_space<vmem>>, vector<6x128xf32>
    %223 = arith.addf %222, %221 : vector<6x128xf32>
    %c0_198 = arith.constant 0 : index
    %c0_199 = arith.constant 0 : index
    %224 = vector.load %arg7[%c0_198, %c0_199] : memref<6x128xf32, #tpu.memory_space<vmem>>, vector<6x128xf32>
    tpu.vector_store %arg7[%c0_198, %c0_199], %223 {strides = array<i32>} : memref<6x128xf32, #tpu.memory_space<vmem>>, vector<6x128xf32>,
    %c0_200 = arith.constant 0 : index
    %c0_201 = arith.constant 0 : index
    %225 = vector.load %arg4[%c0_200, %c0_201] : memref<6x128xf32, #tpu.memory_space<vmem>>, vector<6x128xf32>
    %226 = arith.index_cast %c5_i32_191 : i32 to index
    %c0_202 = arith.constant 0 : index
    %c0_203 = arith.constant 0 : index
    %227 = vector.load %arg2[%226, %c0_202, %c0_203] : memref<8x6x128xf32, #tpu.memory_space<vmem>>, vector<1x6x128xf32>
    %228 = vector.shape_cast %227 : vector<1x6x128xf32> to vector<6x128xf32>
    %229 = arith.mulf %228, %221 : vector<6x128xf32>
    %230 = arith.addf %225, %229 : vector<6x128xf32>
    %c0_204 = arith.constant 0 : index
    %c0_205 = arith.constant 0 : index
    %231 = vector.load %arg4[%c0_204, %c0_205] : memref<6x128xf32, #tpu.memory_space<vmem>>, vector<6x128xf32>
    tpu.vector_store %arg4[%c0_204, %c0_205], %230 {strides = array<i32>} : memref<6x128xf32, #tpu.memory_space<vmem>>, vector<6x128xf32>,
    %c6_i32_206 = arith.constant 6 : i32
    %232 = arith.index_cast %c6_i32_206 : i32 to index
    %c0_207 = arith.constant 0 : index
    %c0_208 = arith.constant 0 : index
    %233 = vector.load %arg5[%232, %c0_207, %c0_208] : memref<8x6x128xf32, #tpu.memory_space<vmem>>, vector<1x6x128xf32>
    %234 = vector.shape_cast %233 : vector<1x6x128xf32> to vector<6x128xf32>
    %c0_209 = arith.constant 0 : index
    %c0_210 = arith.constant 0 : index
    %235 = vector.load %arg6[%c0_209, %c0_210] : memref<6x128xf32, #tpu.memory_space<vmem>>, vector<6x128xf32>
    %236 = arith.subf %234, %235 : vector<6x128xf32>
    %237 = math.exp %236 : vector<6x128xf32>
    %c0_211 = arith.constant 0 : index
    %c0_212 = arith.constant 0 : index
    %238 = vector.load %arg7[%c0_211, %c0_212] : memref<6x128xf32, #tpu.memory_space<vmem>>, vector<6x128xf32>
    %239 = arith.addf %238, %237 : vector<6x128xf32>
    %c0_213 = arith.constant 0 : index
    %c0_214 = arith.constant 0 : index
    %240 = vector.load %arg7[%c0_213, %c0_214] : memref<6x128xf32, #tpu.memory_space<vmem>>, vector<6x128xf32>
    tpu.vector_store %arg7[%c0_213, %c0_214], %239 {strides = array<i32>} : memref<6x128xf32, #tpu.memory_space<vmem>>, vector<6x128xf32>,
    %c0_215 = arith.constant 0 : index
    %c0_216 = arith.constant 0 : index
    %241 = vector.load %arg4[%c0_215, %c0_216] : memref<6x128xf32, #tpu.memory_space<vmem>>, vector<6x128xf32>
    %242 = arith.index_cast %c6_i32_206 : i32 to index
    %c0_217 = arith.constant 0 : index
    %c0_218 = arith.constant 0 : index
    %243 = vector.load %arg2[%242, %c0_217, %c0_218] : memref<8x6x128xf32, #tpu.memory_space<vmem>>, vector<1x6x128xf32>
    %244 = vector.shape_cast %243 : vector<1x6x128xf32> to vector<6x128xf32>
    %245 = arith.mulf %244, %237 : vector<6x128xf32>
    %246 = arith.addf %241, %245 : vector<6x128xf32>
    %c0_219 = arith.constant 0 : index
    %c0_220 = arith.constant 0 : index
    %247 = vector.load %arg4[%c0_219, %c0_220] : memref<6x128xf32, #tpu.memory_space<vmem>>, vector<6x128xf32>
    tpu.vector_store %arg4[%c0_219, %c0_220], %246 {strides = array<i32>} : memref<6x128xf32, #tpu.memory_space<vmem>>, vector<6x128xf32>,
    %c7_i32_221 = arith.constant 7 : i32
    %248 = arith.index_cast %c7_i32_221 : i32 to index
    %c0_222 = arith.constant 0 : index
    %c0_223 = arith.constant 0 : index
    %249 = vector.load %arg5[%248, %c0_222, %c0_223] : memref<8x6x128xf32, #tpu.memory_space<vmem>>, vector<1x6x128xf32>
    %250 = vector.shape_cast %249 : vector<1x6x128xf32> to vector<6x128xf32>
    %c0_224 = arith.constant 0 : index
    %c0_225 = arith.constant 0 : index
    %251 = vector.load %arg6[%c0_224, %c0_225] : memref<6x128xf32, #tpu.memory_space<vmem>>, vector<6x128xf32>
    %252 = arith.subf %250, %251 : vector<6x128xf32>
    %253 = math.exp %252 : vector<6x128xf32>
    %c0_226 = arith.constant 0 : index
    %c0_227 = arith.constant 0 : index
    %254 = vector.load %arg7[%c0_226, %c0_227] : memref<6x128xf32, #tpu.memory_space<vmem>>, vector<6x128xf32>
    %255 = arith.addf %254, %253 : vector<6x128xf32>
    %c0_228 = arith.constant 0 : index
    %c0_229 = arith.constant 0 : index
    %256 = vector.load %arg7[%c0_228, %c0_229] : memref<6x128xf32, #tpu.memory_space<vmem>>, vector<6x128xf32>
    tpu.vector_store %arg7[%c0_228, %c0_229], %255 {strides = array<i32>} : memref<6x128xf32, #tpu.memory_space<vmem>>, vector<6x128xf32>,
    %c0_230 = arith.constant 0 : index
    %c0_231 = arith.constant 0 : index
    %257 = vector.load %arg4[%c0_230, %c0_231] : memref<6x128xf32, #tpu.memory_space<vmem>>, vector<6x128xf32>
    %258 = arith.index_cast %c7_i32_221 : i32 to index
    %c0_232 = arith.constant 0 : index
    %c0_233 = arith.constant 0 : index
    %259 = vector.load %arg2[%258, %c0_232, %c0_233] : memref<8x6x128xf32, #tpu.memory_space<vmem>>, vector<1x6x128xf32>
    %260 = vector.shape_cast %259 : vector<1x6x128xf32> to vector<6x128xf32>
    %261 = arith.mulf %260, %253 : vector<6x128xf32>
    %262 = arith.addf %257, %261 : vector<6x128xf32>
    %c0_234 = arith.constant 0 : index
    %c0_235 = arith.constant 0 : index
    %263 = vector.load %arg4[%c0_234, %c0_235] : memref<6x128xf32, #tpu.memory_space<vmem>>, vector<6x128xf32>
    tpu.vector_store %arg4[%c0_234, %c0_235], %262 {strides = array<i32>} : memref<6x128xf32, #tpu.memory_space<vmem>>, vector<6x128xf32>,
    %c7_i32_236 = arith.constant 7 : i32
    %c0_237 = arith.constant 0 : index
    %c0_238 = arith.constant 0 : index
    %264 = vector.load %arg7[%c0_237, %c0_238] : memref<6x128xf32, #tpu.memory_space<vmem>>, vector<6x128xf32>
    %265 = tpu.reciprocal %264 {approx = true} : vector<6x128xf32> -> vector<6x128xf32>
    %266 = arith.mulf %264, %265 : vector<6x128xf32>
    %cst_239 = arith.constant 2.000000e+00 : f32
    %267 = vector.broadcast %cst_239 : f32 to vector<6x128xf32>
    %268 = arith.subf %267, %266 : vector<6x128xf32>
    %269 = arith.mulf %265, %268 : vector<6x128xf32>
    %c0_240 = arith.constant 0 : index
    %c0_241 = arith.constant 0 : index
    %270 = vector.load %arg4[%c0_240, %c0_241] : memref<6x128xf32, #tpu.memory_space<vmem>>, vector<6x128xf32>
    %271 = arith.mulf %270, %269 : vector<6x128xf32>
    %c0_242 = arith.constant 0 : index
    %c0_243 = arith.constant 0 : index
    %272 = vector.load %arg1[%c0_242, %c0_243] : memref<6x128xf32, #tpu.memory_space<vmem>>, vector<6x128xf32>
    %273 = arith.mulf %271, %272 : vector<6x128xf32>
    %c0_244 = arith.constant 0 : index
    %c0_245 = arith.constant 0 : index
    %274 = vector.load %arg4[%c0_244, %c0_245] : memref<6x128xf32, #tpu.memory_space<vmem>>, vector<6x128xf32>
    tpu.vector_store %arg4[%c0_244, %c0_245], %273 {strides = array<i32>} : memref<6x128xf32, #tpu.memory_space<vmem>>, vector<6x128xf32>,
    return
  }
  func.func @transform_0(%arg0: i32) -> (i32, i32) {
    %c0_i32 = arith.constant 0 : i32
    %c0_i32_0 = arith.constant 0 : i32
    return %arg0, %c0_i32 : i32, i32
  }
  func.func @transform_1(%arg0: i32) -> (i32, i32, i32) {
    %c0_i32 = arith.constant 0 : i32
    %c0_i32_0 = arith.constant 0 : i32
    %c0_i32_1 = arith.constant 0 : i32
    return %c0_i32, %arg0, %c0_i32_0 : i32, i32, i32
  }
  func.func @transform_2(%arg0: i32) -> (i32, i32) {
    %c0_i32 = arith.constant 0 : i32
    %c0_i32_0 = arith.constant 0 : i32
    %c0_i32_1 = arith.constant 0 : i32
    return %c0_i32, %c0_i32_0 : i32, i32
  }
  func.func @transform_3(%arg0: i32) -> (i32, i32) {
    %c0_i32 = arith.constant 0 : i32
    %c0_i32_0 = arith.constant 0 : i32
    return %arg0, %c0_i32 : i32, i32
  }
}

</mosaic_0001>

<bundles_post_ra>
// kernel: tpu_custom_call.1
= control target key start
LH: loop header
LB: loop body
LE: loop exit
PB: predicated region body
PF: predicated region fallthrough
CT: control target
= control target key end

     0   :  { %8 = vsyncpa [#allocation6], 0  ;;  %s1795_s0 = inlined_call_operand.vmem [shape: f32[6,128], index: 0, kind: input, shape index: {}]   ;;  %s1796_s1 = inlined_call_operand.vmem [shape: f32[8,6,128], index: 1, kind: input, shape index: {}]   ;;  %s1797_s2 = inlined_call_operand.hbm [shape: f32[128,128], index: 2, kind: input, shape index: {}]   ;;  %s1798_s3 = inlined_call_operand.hbm [shape: f32[6,128], index: 3, kind: output, shape index: {}]  }
   0x1   :  { %9 = vsyncpa [#allocation7], 0  ;;  %s1509_s12 = smov [#allocation5]   ;;  %s1461_s16 = scalar_lea.hbm %s1797_s2, 2048 }
   0x2   :  { %s19_s13 = sshll.u32 %s1509_s12, 4  ;;  %p1462_p0 = scmp.ne.s32.totalorder %s1797_s2, %s1461_s16  ;;  %s20_s13 = int_to_ptr.vmem [resolvable:$true] %s19_s13 }
   0x3   :  { %p1465_p1 = scmp.lt.u32.totalorder %s1461_s16, %s1797_s2 }
   0x5   :  { %p1467_p2 = pnand %p1465_p1, %p1462_p0 }
   0x7   :  { %1470 = shalt.err (!%p1467_p2)
}
   0x8   :  { %s1471_s21 = scalar_lea.vmem %s20_s13, 2048  ;;  %p1476_p4 = scmp.lt.s32.totalorder %s20_s13, %s20_s13 }
   0x9   :  { %p1472_p3 = scmp.ne.s32.totalorder %s20_s13, %s1471_s21  ;;  %p1477_p5 = scmp.lt.s32.totalorder %s1471_s21, %s1471_s21 }
   0xb   :  { %p1478_p6 = por %p1477_p5, %p1476_p4 }
   0xd   :  { %p1479_p7 = pnand %p1478_p6, %p1472_p3 }
   0xf   :  { %1482 = shalt.err (!%p1479_p7)
}
  0x10   :  { %s1510_s22 = smov 128   ;;  %s1511_s23 = smov 8  }
  0x11   :  { %25 = dma.hbm_to_vmem [thread:$0]  %s1797_s2, 2048, %s20_s13, [#allocation6], %s1510_s22, %s1510_s22, %s1511_s23  }
  0x12   :  { %1505 = dma.done.wait [#allocation6], 2048  }
  0x13   :  { %1506 = vsyncadd [#allocation6], 4294965248  ;;  %v1512_v0 = vmov 0.0|0.0   ;;  %vm1513_vm0 = vmmov 0   ;;  %v1514_v1 = vmov 0.0   ;;  %v29_v2 = vld [vmem:[#allocation5] sm:$0xff] }
  0x14   :  { %1244 = vmatprep.subr.bf16.mxu0 %v1512_v0  ;;  %1268 = vmatprep.subr.bf16.mxu1 %v1512_v0  ;;  %v30_v3 = vld [vmem:[#allocation5 + $0x8] sm:$0xff]  ;;  %v31_v4 = vld [vmem:[#allocation5 + $0x10] sm:$0xff]  ;;  %v32_v6 = vld [vmem:[#allocation5 + $0x18] sm:$0xff]  ;;  %s1515_s20 = smov [#allocation8]  }
  0x15   :  { %996 = vmatprep.mubr.msk.f32.mxu0 %vm1513_vm0, %v1514_v1  ;;  %1031 = vmatprep.mubr.msk.f32.mxu1 %vm1513_vm0, %v1514_v1  ;;  %v1554_v5 = vpack.c.bf16 %v30_v3, %v29_v2  ;;  %v1557_v7 = vpack.c.bf16 %v32_v6, %v31_v4  ;;  %v33_v8 = vld [vmem:[#allocation5 + $0x20] sm:$0xff]  ;;  %v34_v9 = vld [vmem:[#allocation5 + $0x28] sm:$0xff]  ;;  %v35_v11 = vld [vmem:[#allocation5 + $0x30] sm:$0xff] }
  0x16   :  { %v1563_v10 = vpack.c.bf16 %v34_v9, %v33_v8  ;;  %v36_v12 = vld [vmem:[#allocation5 + $0x38] sm:$0xff]  ;;  %v37_v14 = vld [vmem:[#allocation5 + $0x40] sm:$0xff]  ;;  %v38_v15 = vld [vmem:[#allocation5 + $0x48] sm:$0xff] }
  0x17   :  { %1246 = vmatpush3.bf16.msra.mxu0 %v1554_v5  ;;  %1270 = vmatpush3.bf16.msra.mxu1 %v1554_v5  ;;  %v1569_v13 = vpack.c.bf16 %v36_v12, %v35_v11  ;;  %v1575_v16 = vpack.c.bf16 %v38_v15, %v37_v14  ;;  %v39_v17 = vld [vmem:[#allocation5 + $0x50] sm:$0xff]  ;;  %v40_v18 = vld [vmem:[#allocation5 + $0x58] sm:$0xff]  ;;  %v41_v20 = vld [vmem:[#allocation5 + $0x60] sm:$0xff] }
  0x18   :  { %1247 = vmatprep.subr.bf16.mxu0 %v1512_v0  ;;  %1271 = vmatprep.subr.bf16.mxu1 %v1512_v0  ;;  %v1581_v19 = vpack.c.bf16 %v40_v18, %v39_v17  ;;  %v42_v21 = vld [vmem:[#allocation5 + $0x68] sm:$0xff]  ;;  %v45_v22 = vld [vmem:[%s1795_s0] sm:$0x3f]  ;;  %v814_v26 = vld [vmem:[%s1796_s1 + $0x8] sm:$0x3f] }
  0x19   :  { %v1590_v23 = vpack.c.bf16 %v42_v21, %v41_v20  ;;  %v46_v24 = vld [vmem:[%s1796_s1] sm:$0x3f]  ;;  %v44_v28 = vld [vmem:[#allocation5 + $0x78] sm:$0xff]  ;;  %v815_v35 = vld [vmem:[%s1796_s1 + $0x10] sm:$0x3f] }
  0x1a   :  { %v120_v25 = vld [vmem:[%s1795_s0] sm:$0x3f]  ;;  %v47_v29 = vmul.f32 %v46_v24, %v45_v22  ;;  %v816_v37 = vld [vmem:[%s1796_s1 + $0x18] sm:$0x3f]  ;;  %v818_v45 = vld [vmem:[%s1796_s1 + $0x28] sm:$0x3f] }
  0x1b   :  { %1249 = vmatpush3.bf16.msra.mxu0 %v1557_v7  ;;  %1273 = vmatpush3.bf16.msra.mxu1 %v1557_v7  ;;  %v43_v27 = vld [vmem:[#allocation5 + $0x70] sm:$0xff]  ;;  %v123_v30 = vmul.f32 %v814_v26, %v120_v25  ;;  %v819_v51 = vld [vmem:[%s1796_s1 + $0x30] sm:$0x3f]  ;;  %v820_v53 = vld [vmem:[%s1796_s1 + $0x38] sm:$0x3f] }
  0x1c   :  { %1250 = vmatprep.subr.bf16.mxu0 %v1512_v0  ;;  %1274 = vmatprep.subr.bf16.mxu1 %v1512_v0  ;;  %v1605_v31 = vpack.c.bf16 %v44_v28, %v43_v27  ;;  %v48_v32 = vmax.f32 %v47_v29, 0.0  ;;  %v197_v34 = vld [vmem:[%s1795_s0] sm:$0x3f] }
  0x1d   :  { %v124_v33 = vmax.f32 %v123_v30, 0.0  ;;  %v274_v36 = vld [vmem:[%s1795_s0] sm:$0x3f]  ;;  %v200_v38 = vmul.f32 %v815_v35, %v197_v34 }
  0x1e   :  { %v277_v39 = vmul.f32 %v816_v37, %v274_v36  ;;  %v351_v42 = vld [vmem:[%s1795_s0] sm:$0x3f] }
  0x1f   :  { %1252 = vmatpush3.bf16.msra.mxu0 %v1563_v10  ;;  %1276 = vmatpush3.bf16.msra.mxu1 %v1563_v10  ;;  %v201_v40 = vmax.f32 %v200_v38, 0.0  ;;  %v817_v43 = vld [vmem:[%s1796_s1 + $0x20] sm:$0x3f] }
  0x20   :  { %1253 = vmatprep.subr.bf16.mxu0 %v1512_v0  ;;  %1277 = vmatprep.subr.bf16.mxu1 %v1512_v0  ;;  %v278_v41 = vmax.f32 %v277_v39, 0.0  ;;  %v428_v44 = vld [vmem:[%s1795_s0] sm:$0x3f]  ;;  %v354_v46 = vmul.f32 %v817_v43, %v351_v42 }
  0x21   :  { %v431_v47 = vmul.f32 %v818_v45, %v428_v44  ;;  %v505_v50 = vld [vmem:[%s1795_s0] sm:$0x3f] }
  0x22   :  { %v355_v48 = vmax.f32 %v354_v46, 0.0  ;;  %v582_v52 = vld [vmem:[%s1795_s0] sm:$0x3f]  ;;  %v508_v54 = vmul.f32 %v819_v51, %v505_v50 }
  0x23   :  { %1255 = vmatpush3.bf16.msra.mxu0 %v1569_v13  ;;  %1279 = vmatpush3.bf16.msra.mxu1 %v1569_v13  ;;  %v432_v49 = vmax.f32 %v431_v47, 0.0  ;;  %v585_v55 = vmul.f32 %v820_v53, %v582_v52  ;;  %v695_v43 = vld [vmem:[%s1796_s1] sm:$0x3f] }
  0x24   :  { %1256 = vmatprep.subr.bf16.mxu0 %v1512_v0  ;;  %1280 = vmatprep.subr.bf16.mxu1 %v1512_v0  ;;  %v509_v56 = vmax.f32 %v508_v54, 0.0 }
  0x25   :  { %v586_v57 = vmax.f32 %v585_v55, 0.0 }
  0x27   :  { %1258 = vmatpush3.bf16.msra.mxu0 %v1575_v16  ;;  %1282 = vmatpush3.bf16.msra.mxu1 %v1575_v16 }
  0x28   :  { %1259 = vmatprep.subr.bf16.mxu0 %v1512_v0  ;;  %1283 = vmatprep.subr.bf16.mxu1 %v1512_v0 }
  0x2b   :  { %1261 = vmatpush3.bf16.msra.mxu0 %v1581_v19  ;;  %1285 = vmatpush3.bf16.msra.mxu1 %v1581_v19 }
  0x2c   :  { %1262 = vmatprep.subr.bf16.mxu0 %v1512_v0  ;;  %1286 = vmatprep.subr.bf16.mxu1 %v1512_v0 }
  0x2f   :  { %1264 = vmatpush3.bf16.msra.mxu0 %v1590_v23  ;;  %1288 = vmatpush3.bf16.msra.mxu1 %v1590_v23 }
  0x30   :  { %1265 = vmatprep.subr.bf16.mxu0 %v1512_v0  ;;  %1289 = vmatprep.subr.bf16.mxu1 %v1512_v0 }
  0x33   :  { %1267 = vmatpush3.bf16.msra.mxu0 %v1605_v31  ;;  %1291 = vmatpush3.bf16.msra.mxu1 %v1605_v31 }
  0x34   :  { %1292 = vmatprep.subr.bf16.mxu0 %v1512_v0  ;;  %1316 = vmatprep.subr.bf16.mxu1 %v1512_v0 }
  0x36   :  { %997 = vmatmul.mubr.f32.vlgmr.msra.gmra.mrb[0].mxu0 %v48_v32  ;;  %1032 = vmatmul.mubr.f32.vlgmr.msra.gmra.mrb[0].mxu1 %v124_v33 }
  0x37   :  { %1294 = vmatpush3.bf16.msra.mxu0 %v1554_v5  ;;  %1318 = vmatpush3.bf16.msra.mxu1 %v1554_v5 }
  0x38   :  { %1295 = vmatprep.subr.bf16.mxu0 %v1512_v0  ;;  %1319 = vmatprep.subr.bf16.mxu1 %v1512_v0 }
  0x39   :  { %1066 = vmatprep.mubr.msk.f32.mxu0 %vm1513_vm0, %v1514_v1  ;;  %1101 = vmatprep.mubr.msk.f32.mxu1 %vm1513_vm0, %v1514_v1 }
  0x3b   :  { %1297 = vmatpush3.bf16.msra.mxu0 %v1557_v7  ;;  %1321 = vmatpush3.bf16.msra.mxu1 %v1557_v7 }
  0x3c   :  { %1298 = vmatprep.subr.bf16.mxu0 %v1512_v0  ;;  %1322 = vmatprep.subr.bf16.mxu1 %v1512_v0 }
  0x3f   :  { %1300 = vmatpush3.bf16.msra.mxu0 %v1563_v10  ;;  %1324 = vmatpush3.bf16.msra.mxu1 %v1563_v10 }
  0x40   :  { %1301 = vmatprep.subr.bf16.mxu0 %v1512_v0  ;;  %1325 = vmatprep.subr.bf16.mxu1 %v1512_v0 }
  0x43   :  { %1303 = vmatpush3.bf16.msra.mxu0 %v1569_v13  ;;  %1327 = vmatpush3.bf16.msra.mxu1 %v1569_v13 }
  0x44   :  { %1304 = vmatprep.subr.bf16.mxu0 %v1512_v0  ;;  %1328 = vmatprep.subr.bf16.mxu1 %v1512_v0 }
  0x47   :  { %1306 = vmatpush3.bf16.msra.mxu0 %v1575_v16  ;;  %1330 = vmatpush3.bf16.msra.mxu1 %v1575_v16 }
  0x48   :  { %1307 = vmatprep.subr.bf16.mxu0 %v1512_v0  ;;  %1331 = vmatprep.subr.bf16.mxu1 %v1512_v0 }
  0x4b   :  { %1309 = vmatpush3.bf16.msra.mxu0 %v1581_v19  ;;  %1333 = vmatpush3.bf16.msra.mxu1 %v1581_v19 }
  0x4c   :  { %1310 = vmatprep.subr.bf16.mxu0 %v1512_v0  ;;  %1334 = vmatprep.subr.bf16.mxu1 %v1512_v0 }
  0x4f   :  { %1312 = vmatpush3.bf16.msra.mxu0 %v1590_v23  ;;  %1336 = vmatpush3.bf16.msra.mxu1 %v1590_v23 }
  0x50   :  { %1313 = vmatprep.subr.bf16.mxu0 %v1512_v0  ;;  %1337 = vmatprep.subr.bf16.mxu1 %v1512_v0 }
  0x53   :  { %1315 = vmatpush3.bf16.msra.mxu0 %v1605_v31  ;;  %1339 = vmatpush3.bf16.msra.mxu1 %v1605_v31 }
  0x54   :  { %1340 = vmatprep.subr.bf16.mxu0 %v1512_v0  ;;  %1364 = vmatprep.subr.bf16.mxu1 %v1512_v0 }
  0x56   :  { %1067 = vmatmul.mubr.f32.vlgmr.msra.gmra.mrb[2].mxu0 %v201_v40  ;;  %1102 = vmatmul.mubr.f32.vlgmr.msra.gmra.mrb[2].mxu1 %v278_v41 }
  0x57   :  { %1342 = vmatpush3.bf16.msra.mxu0 %v1554_v5  ;;  %1366 = vmatpush3.bf16.msra.mxu1 %v1554_v5 }
  0x58   :  { %1343 = vmatprep.subr.bf16.mxu0 %v1512_v0  ;;  %1367 = vmatprep.subr.bf16.mxu1 %v1512_v0 }
  0x59   :  { %1136 = vmatprep.mubr.msk.f32.mxu0 %vm1513_vm0, %v1514_v1  ;;  %1171 = vmatprep.mubr.msk.f32.mxu1 %vm1513_vm0, %v1514_v1 }
  0x5b   :  { %1345 = vmatpush3.bf16.msra.mxu0 %v1557_v7  ;;  %1369 = vmatpush3.bf16.msra.mxu1 %v1557_v7 }
  0x5c   :  { %1346 = vmatprep.subr.bf16.mxu0 %v1512_v0  ;;  %1370 = vmatprep.subr.bf16.mxu1 %v1512_v0 }
  0x5f   :  { %1348 = vmatpush3.bf16.msra.mxu0 %v1563_v10  ;;  %1372 = vmatpush3.bf16.msra.mxu1 %v1563_v10 }
  0x60   :  { %1349 = vmatprep.subr.bf16.mxu0 %v1512_v0  ;;  %1373 = vmatprep.subr.bf16.mxu1 %v1512_v0 }
  0x63   :  { %1351 = vmatpush3.bf16.msra.mxu0 %v1569_v13  ;;  %1375 = vmatpush3.bf16.msra.mxu1 %v1569_v13 }
  0x64   :  { %1352 = vmatprep.subr.bf16.mxu0 %v1512_v0  ;;  %1376 = vmatprep.subr.bf16.mxu1 %v1512_v0 }
  0x67   :  { %1354 = vmatpush3.bf16.msra.mxu0 %v1575_v16  ;;  %1378 = vmatpush3.bf16.msra.mxu1 %v1575_v16 }
  0x68   :  { %1355 = vmatprep.subr.bf16.mxu0 %v1512_v0  ;;  %1379 = vmatprep.subr.bf16.mxu1 %v1512_v0 }
  0x6b   :  { %1357 = vmatpush3.bf16.msra.mxu0 %v1581_v19  ;;  %1381 = vmatpush3.bf16.msra.mxu1 %v1581_v19 }
  0x6c   :  { %1358 = vmatprep.subr.bf16.mxu0 %v1512_v0  ;;  %1382 = vmatprep.subr.bf16.mxu1 %v1512_v0 }
  0x6f   :  { %1360 = vmatpush3.bf16.msra.mxu0 %v1590_v23  ;;  %1384 = vmatpush3.bf16.msra.mxu1 %v1590_v23 }
  0x70   :  { %1361 = vmatprep.subr.bf16.mxu0 %v1512_v0  ;;  %1385 = vmatprep.subr.bf16.mxu1 %v1512_v0 }
  0x73   :  { %1363 = vmatpush3.bf16.msra.mxu0 %v1605_v31  ;;  %1387 = vmatpush3.bf16.msra.mxu1 %v1605_v31 }
  0x74   :  { %1388 = vmatprep.subr.bf16.mxu0 %v1512_v0  ;;  %1412 = vmatprep.subr.bf16.mxu1 %v1512_v0 }
  0x76   :  { %1137 = vmatmul.mubr.f32.vlgmr.msra.gmra.mrb[4].mxu0 %v355_v48  ;;  %1172 = vmatmul.mubr.f32.vlgmr.msra.gmra.mrb[4].mxu1 %v432_v49  ;;  %v821_v49 = vld [vmem:[%s1796_s1 + $0x8] sm:$0x3f] }
  0x77   :  { %1390 = vmatpush3.bf16.msra.mxu0 %v1554_v5  ;;  %1414 = vmatpush3.bf16.msra.mxu1 %v1554_v5 }
  0x78   :  { %1391 = vmatprep.subr.bf16.mxu0 %v1512_v0  ;;  %1415 = vmatprep.subr.bf16.mxu1 %v1512_v0 }
  0x79   :  { %1206 = vmatprep.mubr.msk.f32.mxu0 %vm1513_vm0, %v1514_v1  ;;  %1241 = vmatprep.mubr.msk.f32.mxu1 %vm1513_vm0, %v1514_v1 }
  0x7b   :  { %1393 = vmatpush3.bf16.msra.mxu0 %v1557_v7  ;;  %1417 = vmatpush3.bf16.msra.mxu1 %v1557_v7 }
  0x7c   :  { %1394 = vmatprep.subr.bf16.mxu0 %v1512_v0  ;;  %1418 = vmatprep.subr.bf16.mxu1 %v1512_v0 }
  0x7f   :  { %1396 = vmatpush3.bf16.msra.mxu0 %v1563_v10  ;;  %1420 = vmatpush3.bf16.msra.mxu1 %v1563_v10 }
  0x80   :  { %1397 = vmatprep.subr.bf16.mxu0 %v1512_v0  ;;  %1421 = vmatprep.subr.bf16.mxu1 %v1512_v0 }
  0x83   :  { %1399 = vmatpush3.bf16.msra.mxu0 %v1569_v13  ;;  %1423 = vmatpush3.bf16.msra.mxu1 %v1569_v13 }
  0x84   :  { %1400 = vmatprep.subr.bf16.mxu0 %v1512_v0  ;;  %1424 = vmatprep.subr.bf16.mxu1 %v1512_v0 }
  0x87   :  { %1402 = vmatpush3.bf16.msra.mxu0 %v1575_v16  ;;  %1426 = vmatpush3.bf16.msra.mxu1 %v1575_v16 }
  0x88   :  { %1403 = vmatprep.subr.bf16.mxu0 %v1512_v0  ;;  %1427 = vmatprep.subr.bf16.mxu1 %v1512_v0 }
  0x8b   :  { %1405 = vmatpush3.bf16.msra.mxu0 %v1581_v19  ;;  %1429 = vmatpush3.bf16.msra.mxu1 %v1581_v19 }
  0x8c   :  { %1406 = vmatprep.subr.bf16.mxu0 %v1512_v0  ;;  %1430 = vmatprep.subr.bf16.mxu1 %v1512_v0 }
  0x8f   :  { %1408 = vmatpush3.bf16.msra.mxu0 %v1590_v23  ;;  %1432 = vmatpush3.bf16.msra.mxu1 %v1590_v23 }
  0x90   :  { %1409 = vmatprep.subr.bf16.mxu0 %v1512_v0  ;;  %1433 = vmatprep.subr.bf16.mxu1 %v1512_v0 }
  0x93   :  { %1411 = vmatpush3.bf16.msra.mxu0 %v1605_v31  ;;  %1435 = vmatpush3.bf16.msra.mxu1 %v1605_v31 }
  0x96   :  { %1207 = vmatmul.mubr.f32.vlgmr.msra.gmra.mrb[6].mxu0 %v509_v56  ;;  %1242 = vmatmul.mubr.f32.vlgmr.msra.gmra.mrb[6].mxu1 %v586_v57 }
 0x109   :  { %v115_v58 = vpop.f32.mrb[0].mxu0  ;;  %v191_v59 = vpop.f32.mrb[0].mxu1 }
 0x10a   :  { %119 = vst [vmem:[#allocation2] sm:$0x3f] %v115_v58  ;;  %v998_v60 = vpop.f32.mrb[1].mxu0  ;;  %196 = vst [vmem:[#allocation2 + $0x8] sm:$0x3f] %v191_v59  ;;  %v1033_v61 = vpop.f32.mrb[1].mxu1 }
 0x10b   :  { %v822_v60 = vld [vmem:[%s1796_s1 + $0x10] sm:$0x3f] }
 0x111   :  { %v659_v62 = vld [vmem:[#allocation2] sm:$0x3f]  ;;  %v662_v63 = vld [vmem:[#allocation2 + $0x8] sm:$0x3f] }
 0x112   :  { %660 = vst [vmem:[#allocation3] sm:$0x3f] %v659_v62  ;;  %v689_v32 = vld [vmem:[#allocation2] sm:$0x3f]  ;;  %v698_v36 = vld [vmem:[#allocation2 + $0x8] sm:$0x3f] }
 0x119   :  { %v661_v1 = vld [vmem:[#allocation3] sm:$0x3f] }
 0x11a   :  { %v663_v2 = vmax.f32 %v661_v1, %v662_v63 }
 0x11c   :  { %664 = vst [vmem:[#allocation3] sm:$0x3f] %v663_v2 }
 0x123   :  { %v665_v6 = vld [vmem:[#allocation3] sm:$0x3f] }
 0x129   :  { %v268_v0 = vpop.f32.mrb[2].mxu0  ;;  %v345_v3 = vpop.f32.mrb[2].mxu1 }
 0x12a   :  { %273 = vst [vmem:[#allocation2 + $0x10] sm:$0x3f] %v268_v0  ;;  %v1068_v4 = vpop.f32.mrb[3].mxu0  ;;  %350 = vst [vmem:[#allocation2 + $0x18] sm:$0x3f] %v345_v3  ;;  %v1103_v5 = vpop.f32.mrb[3].mxu1 }
 0x131   :  { %v666_v7 = vld [vmem:[#allocation2 + $0x10] sm:$0x3f]  ;;  %v670_v9 = vld [vmem:[#allocation2 + $0x18] sm:$0x3f] }
 0x132   :  { %v667_v8 = vmax.f32 %v665_v6, %v666_v7  ;;  %v711_v41 = vld [vmem:[#allocation2 + $0x10] sm:$0x3f]  ;;  %v724_v50 = vld [vmem:[#allocation2 + $0x18] sm:$0x3f] }
 0x133   :  { %v823_v7 = vld [vmem:[%s1796_s1 + $0x18] sm:$0x3f] }
 0x134   :  { %668 = vst [vmem:[#allocation3] sm:$0x3f] %v667_v8 }
 0x13b   :  { %v669_v10 = vld [vmem:[#allocation3] sm:$0x3f] }
 0x13c   :  { %v671_v11 = vmax.f32 %v669_v10, %v670_v9 }
 0x13e   :  { %672 = vst [vmem:[#allocation3] sm:$0x3f] %v671_v11 }
 0x145   :  { %v673_v16 = vld [vmem:[#allocation3] sm:$0x3f] }
 0x149   :  { %v422_v12 = vpop.f32.mrb[4].mxu0  ;;  %v499_v13 = vpop.f32.mrb[4].mxu1 }
 0x14a   :  { %427 = vst [vmem:[#allocation2 + $0x20] sm:$0x3f] %v422_v12  ;;  %v1138_v14 = vpop.f32.mrb[5].mxu0  ;;  %504 = vst [vmem:[#allocation2 + $0x28] sm:$0x3f] %v499_v13  ;;  %v1173_v15 = vpop.f32.mrb[5].mxu1 }
 0x151   :  { %v674_v17 = vld [vmem:[#allocation2 + $0x20] sm:$0x3f]  ;;  %v678_v19 = vld [vmem:[#allocation2 + $0x28] sm:$0x3f] }
 0x152   :  { %v675_v18 = vmax.f32 %v673_v16, %v674_v17  ;;  %v737_v61 = vld [vmem:[#allocation2 + $0x20] sm:$0x3f]  ;;  %v750_v8 = vld [vmem:[#allocation2 + $0x28] sm:$0x3f] }
 0x154   :  { %676 = vst [vmem:[#allocation3] sm:$0x3f] %v675_v18  ;;  %v824_v18 = vld [vmem:[%s1796_s1 + $0x20] sm:$0x3f] }
 0x15b   :  { %v677_v20 = vld [vmem:[#allocation3] sm:$0x3f] }
 0x15c   :  { %v679_v21 = vmax.f32 %v677_v20, %v678_v19 }
 0x15e   :  { %680 = vst [vmem:[#allocation3] sm:$0x3f] %v679_v21 }
 0x165   :  { %v681_v26 = vld [vmem:[#allocation3] sm:$0x3f] }
 0x169   :  { %v576_v22 = vpop.f32.mrb[6].mxu0  ;;  %v653_v23 = vpop.f32.mrb[6].mxu1 }
 0x16a   :  { %581 = vst [vmem:[#allocation2 + $0x30] sm:$0x3f] %v576_v22  ;;  %v1208_v24 = vpop.f32.mrb[7].mxu0  ;;  %658 = vst [vmem:[#allocation2 + $0x38] sm:$0x3f] %v653_v23  ;;  %v1243_v25 = vpop.f32.mrb[7].mxu1 }
 0x171   :  { %v682_v27 = vld [vmem:[#allocation2 + $0x30] sm:$0x3f]  ;;  %v686_v29 = vld [vmem:[#allocation2 + $0x38] sm:$0x3f] }
 0x172   :  { %v683_v28 = vmax.f32 %v681_v26, %v682_v27  ;;  %v763_v19 = vld [vmem:[#allocation2 + $0x30] sm:$0x3f] }
 0x174   :  { %684 = vst [vmem:[#allocation3] sm:$0x3f] %v683_v28 }
 0x17b   :  { %v685_v30 = vld [vmem:[#allocation3] sm:$0x3f] }
 0x17c   :  { %v687_v31 = vmax.f32 %v685_v30, %v686_v29  ;;  %v825_v29 = vld [vmem:[%s1796_s1 + $0x28] sm:$0x3f]  ;;  %v776_v30 = vld [vmem:[#allocation2 + $0x38] sm:$0x3f] }
 0x17e   :  { %688 = vst [vmem:[#allocation3] sm:$0x3f] %v687_v31 }
 0x185   :  { %v690_v33 = vld [vmem:[#allocation3] sm:$0x3f] }
 0x186   :  { %v699_v34 = vld [vmem:[#allocation3] sm:$0x3f]  ;;  %v691_v35 = vsub.f32 %v689_v32, %v690_v33 }
 0x187   :  { %v700_v38 = vsub.f32 %v698_v36, %v699_v34  ;;  %v712_v40 = vld [vmem:[#allocation3] sm:$0x3f] }
 0x188   :  { %v692_v37 = vmul.f32 1.442695, %v691_v35  ;;  %v713_v42 = vsub.f32 %v711_v41, %v712_v40  ;;  %v725_v47 = vld [vmem:[#allocation3] sm:$0x3f] }
 0x189   :  { %v701_v39 = vmul.f32 1.442695, %v700_v38  ;;  %v726_v52 = vsub.f32 %v724_v50, %v725_v47  ;;  %v738_v58 = vld [vmem:[#allocation3] sm:$0x3f] }
 0x18a   :  { %1443 = vpow2.f32 %v692_v37  ;;  %v714_v46 = vmul.f32 1.442695, %v713_v42  ;;  %v739_v63 = vsub.f32 %v737_v61, %v738_v58  ;;  %v751_v5 = vld [vmem:[#allocation3] sm:$0x3f] }
 0x18b   :  { %1445 = vpow2.f32 %v701_v39  ;;  %v727_v57 = vmul.f32 1.442695, %v726_v52  ;;  %v752_v10 = vsub.f32 %v750_v8, %v751_v5  ;;  %v764_v16 = vld [vmem:[#allocation3] sm:$0x3f]  ;;  %v826_v39 = vld [vmem:[%s1796_s1 + $0x30] sm:$0x3f] }
 0x18c   :  { %1447 = vpow2.f32 %v714_v46  ;;  %v740_v4 = vmul.f32 1.442695, %v739_v63  ;;  %v765_v21 = vsub.f32 %v763_v19, %v764_v16  ;;  %v777_v27 = vld [vmem:[#allocation3] sm:$0x3f]  ;;  %v827_v46 = vld [vmem:[%s1796_s1 + $0x38] sm:$0x3f] }
 0x18d   :  { %1449 = vpow2.f32 %v727_v57  ;;  %v753_v15 = vmul.f32 1.442695, %v752_v10  ;;  %v778_v32 = vsub.f32 %v776_v30, %v777_v27  ;;  %v796_v58 = vld [vmem:[%s1795_s0] sm:$0x3f]  ;;  %s805_s1 = sshll.u32 %s1515_s20, 4  ;;  %s806_s1 = int_to_ptr.vmem [resolvable:$true] %s805_s1 }
 0x18e   :  { %1451 = vpow2.f32 %v740_v4  ;;  %v766_v26 = vmul.f32 1.442695, %v765_v21  ;;  %s1483_s21 = scalar_lea.vmem %s806_s1, 128  ;;  %p1488_p9 = scmp.lt.s32.totalorder %s806_s1, %s806_s1 }
 0x18f   :  { %1453 = vpow2.f32 %v753_v15  ;;  %v779_v37 = vmul.f32 1.442695, %v778_v32  ;;  %p1484_p8 = scmp.ne.s32.totalorder %s806_s1, %s1483_s21  ;;  %p1489_p10 = scmp.lt.s32.totalorder %s1483_s21, %s1483_s21 }
 0x190   :  { %1455 = vpow2.f32 %v766_v26 }
 0x191   :  { %1457 = vpow2.f32 %v779_v37  ;;  %p1490_p11 = por %p1489_p10, %p1488_p9 }
 0x193   :  { %p1491_p12 = pnand %p1490_p11, %p1484_p8 }
 0x194   :  { %v1444_v44 = vpop.eup %1443 }
 0x195   :  { %694 = vst [vmem:[#allocation4] sm:$0x3f] %v1444_v44  ;;  %v696_v45 = vmul.f32 %v1444_v44, %v695_v43  ;;  %v1446_v48 = vpop.eup %1445 }
 0x196   :  { %v708_v54 = vmul.f32 %v1446_v48, %v821_v49  ;;  %v1448_v59 = vpop.eup %1447 }
 0x197   :  { %697 = vst [vmem:[#allocation8] sm:$0x3f] %v696_v45  ;;  %v721_v2 = vmul.f32 %v1448_v59, %v822_v60  ;;  %v1450_v6 = vpop.eup %1449 }
 0x198   :  { %v734_v12 = vmul.f32 %v1450_v6, %v823_v7  ;;  %v1452_v17 = vpop.eup %1451 }
 0x199   :  { %v747_v23 = vmul.f32 %v1452_v17, %v824_v18  ;;  %v1454_v28 = vpop.eup %1453 }
 0x19a   :  { %v760_v34 = vmul.f32 %v1454_v28, %v825_v29  ;;  %v1456_v38 = vpop.eup %1455 }
 0x19b   :  { %v773_v42 = vmul.f32 %v1456_v38, %v826_v39  ;;  %v1458_v45 = vpop.eup %1457 }
 0x19c   :  { %v703_v51 = vld [vmem:[#allocation4] sm:$0x3f]  ;;  %v786_v49 = vmul.f32 %v1458_v45, %v827_v46 }
 0x19d   :  { %v704_v53 = vadd.f32 %v1446_v48, %v703_v51 }
 0x19e   :  { %v706_v55 = vld [vmem:[#allocation8] sm:$0x3f] }
 0x19f   :  { %705 = vst [vmem:[#allocation4] sm:$0x3f] %v704_v53  ;;  %v709_v56 = vadd.f32 %v708_v54, %v706_v55 }
 0x1a1   :  { %710 = vst [vmem:[#allocation8] sm:$0x3f] %v709_v56 }
 0x1a6   :  { %v716_v62 = vld [vmem:[#allocation4] sm:$0x3f] }
 0x1a7   :  { %v717_v1 = vadd.f32 %v1448_v59, %v716_v62 }
 0x1a8   :  { %v719_v0 = vld [vmem:[#allocation8] sm:$0x3f] }
 0x1a9   :  { %718 = vst [vmem:[#allocation4] sm:$0x3f] %v717_v1  ;;  %v722_v3 = vadd.f32 %v721_v2, %v719_v0 }
 0x1ab   :  { %723 = vst [vmem:[#allocation8] sm:$0x3f] %v722_v3 }
 0x1b0   :  { %v729_v9 = vld [vmem:[#allocation4] sm:$0x3f] }
 0x1b1   :  { %v730_v11 = vadd.f32 %v1450_v6, %v729_v9 }
 0x1b2   :  { %v732_v13 = vld [vmem:[#allocation8] sm:$0x3f] }
 0x1b3   :  { %731 = vst [vmem:[#allocation4] sm:$0x3f] %v730_v11  ;;  %v735_v14 = vadd.f32 %v734_v12, %v732_v13 }
 0x1b5   :  { %736 = vst [vmem:[#allocation8] sm:$0x3f] %v735_v14 }
 0x1ba   :  { %v742_v20 = vld [vmem:[#allocation4] sm:$0x3f] }
 0x1bb   :  { %v743_v22 = vadd.f32 %v1452_v17, %v742_v20 }
 0x1bc   :  { %v745_v24 = vld [vmem:[#allocation8] sm:$0x3f] }
 0x1bd   :  { %744 = vst [vmem:[#allocation4] sm:$0x3f] %v743_v22  ;;  %v748_v25 = vadd.f32 %v747_v23, %v745_v24 }
 0x1bf   :  { %749 = vst [vmem:[#allocation8] sm:$0x3f] %v748_v25 }
 0x1c4   :  { %v755_v31 = vld [vmem:[#allocation4] sm:$0x3f] }
 0x1c5   :  { %v756_v33 = vadd.f32 %v1454_v28, %v755_v31 }
 0x1c6   :  { %v758_v35 = vld [vmem:[#allocation8] sm:$0x3f] }
 0x1c7   :  { %757 = vst [vmem:[#allocation4] sm:$0x3f] %v756_v33  ;;  %v761_v36 = vadd.f32 %v760_v34, %v758_v35 }
 0x1c9   :  { %762 = vst [vmem:[#allocation8] sm:$0x3f] %v761_v36 }
 0x1ce   :  { %v768_v40 = vld [vmem:[#allocation4] sm:$0x3f] }
 0x1cf   :  { %v769_v41 = vadd.f32 %v1456_v38, %v768_v40 }
 0x1d0   :  { %v771_v43 = vld [vmem:[#allocation8] sm:$0x3f] }
 0x1d1   :  { %770 = vst [vmem:[#allocation4] sm:$0x3f] %v769_v41  ;;  %v774_v44 = vadd.f32 %v773_v42, %v771_v43 }
 0x1d3   :  { %775 = vst [vmem:[#allocation8] sm:$0x3f] %v774_v44 }
 0x1d8   :  { %v781_v47 = vld [vmem:[#allocation4] sm:$0x3f] }
 0x1d9   :  { %v782_v48 = vadd.f32 %v1458_v45, %v781_v47 }
 0x1da   :  { %v784_v50 = vld [vmem:[#allocation8] sm:$0x3f] }
 0x1db   :  { %783 = vst [vmem:[#allocation4] sm:$0x3f] %v782_v48  ;;  %v787_v51 = vadd.f32 %v786_v49, %v784_v50 }
 0x1dd   :  { %788 = vst [vmem:[#allocation8] sm:$0x3f] %v787_v51 }
 0x1e2   :  { %v789_v52 = vld [vmem:[#allocation4] sm:$0x3f] }
 0x1e3   :  { %1459 = vrcp.f32 %v789_v52 }
 0x1e4   :  { %v794_v57 = vld [vmem:[#allocation8] sm:$0x3f] }
 0x1ed   :  { %v1460_v53 = vpop.eup %1459 }
 0x1ee   :  { %v791_v54 = vmul.f32 %v1460_v53, %v789_v52 }
 0x1f0   :  { %v792_v55 = vsub.f32 2.0, %v791_v54 }
 0x1f2   :  { %v793_v56 = vmul.f32 %v1460_v53, %v792_v55 }
 0x1f4   :  { %v795_v59 = vmul.f32 %v794_v57, %v793_v56 }
 0x1f6   :  { %v797_v60 = vmul.f32 %v796_v58, %v795_v59 }
 0x1f8   :  { %798 = vst [vmem:[#allocation8] sm:$0x3f] %v797_v60 }
 0x1f9   :  { %1494 = shalt.err (!%p1491_p12)
}
 0x1fa   :  { %s1495_s24 = scalar_lea.hbm %s1798_s3, 128 }
 0x1fb   :  { %p1496_p13 = scmp.ne.s32.totalorder %s1798_s3, %s1495_s24  ;;  %p1499_p0 = scmp.lt.u32.totalorder %s1495_s24, %s1798_s3 }
 0x1fd   :  { %p1501_p1 = pnand %p1499_p0, %p1496_p13 }
 0x1ff   :  { %1504 = shalt.err (!%p1501_p1)
}
 0x200   :  { %808 = dma.vmem_to_hbm [thread:$0]  %s806_s1, 128, %s1798_s3, [#allocation7]  }
 0x201   :  { %1507 = dma.done.wait [#allocation7], 128  }
 0x202   :  { %1508 = vsyncadd [#allocation7], 4294967168 }
 0x203   :  { %812 = vsyncpa [#allocation6], 1 }
 0x204   :  { %813 = vsyncpa [#allocation7], 1 }

</bundles_post_ra>
